<compile_context>
chip_gen: v6e
topology: v6e:2x2x1
jax: 0.10.0
libtpu: 0.0.40
codegen_flags: <defaults>
</compile_context>

<pallas_src>
import functools
import math

import jax
import jax.numpy as jnp
from jax.experimental import pallas as pl
from jax.experimental.pallas import tpu as pltpu


def _layernorm(x, w, b, eps=1e-5):
    # LayerNorm over the last dim (norm_shape = [num_hiddens]); matches torch.nn.LayerNorm.
    mu = jnp.mean(x, axis=-1, keepdims=True)
    var = jnp.mean((x - mu) * (x - mu), axis=-1, keepdims=True)
    return (x - mu) * jax.lax.rsqrt(var + eps) * w + b


def _encoder_block_kernel(num_heads,
                          # inputs
                          x_ref, vlen_ref,
                          wqkv_ref, wo_ref,
                          ln1w_ref, ln1b_ref,
                          w1_ref, b1_ref, w2_ref, b2_ref,
                          ln2w_ref, ln2b_ref,
                          # output
                          out_ref):
    Bt, S, H = x_ref.shape
    hd = H // num_heads
    inv_sqrt_hd = 1.0 / math.sqrt(hd)
    f32, bf16 = jnp.float32, jnp.bfloat16

    x3 = x_ref[...].astype(f32)                      # (Bt, S, H)
    x2 = x3.reshape(Bt * S, H)                       # flattened rows for the dense matmuls
    x2_bf16 = x2.astype(bf16)

    # ---- fused QKV projection: one MXU pass with N = 3H ---------------------
    qkv = jnp.dot(x2_bf16, wqkv_ref[...], preferred_element_type=f32)    # (Bt*S, 3H)
    q = (qkv[:, :H] * inv_sqrt_hd).reshape(Bt, S, H)  # scale folded into q once
    k = qkv[:, H:2 * H].reshape(Bt, S, H)
    v = qkv[:, 2 * H:].reshape(Bt, S, H)

    # key-padding mask: same mask for every query row / head within a batch element
    col = jax.lax.broadcasted_iota(jnp.int32, (Bt, S, S), 2)
    key_mask = col < vlen_ref[...][:, :, None]        # (Bt, S, S)

    # ---- multi-head attention; accumulate the output projection per head ----
    attn2 = jnp.zeros((Bt * S, H), f32)
    for h in range(num_heads):                        # static unroll over heads
        lo = h * hd
        qh = q[:, :, lo:lo + hd].astype(bf16)         # (Bt, S, hd)
        kh = k[:, :, lo:lo + hd].astype(bf16)
        vh = v[:, :, lo:lo + hd].astype(bf16)
        s = jnp.einsum("bqd,bkd->bqk", qh, kh, preferred_element_type=f32)   # (Bt, S, S)
        s = jnp.where(key_mask, s, -1.0e6)            # masked_softmax mask value
        s = s - jnp.max(s, axis=-1, keepdims=True)
        p = jnp.exp(s)
        p = p * pl.reciprocal(jnp.sum(p, axis=-1, keepdims=True), approx=True)
        ho = jnp.einsum("bqk,bkd->bqd", p.astype(bf16), vh,
                        preferred_element_type=f32)   # (Bt, S, hd)
        attn2 = attn2 + jnp.dot(ho.reshape(Bt * S, hd).astype(bf16),
                                wo_ref[lo:lo + hd, :],
                                preferred_element_type=f32)

    # ---- AddNorm 1 (dropout == identity in eval) -----------------------------
    y2 = _layernorm(x2 + attn2, ln1w_ref[...], ln1b_ref[...])

    # ---- position-wise FFN ----------------------------------------------------
    h1 = jnp.dot(y2.astype(bf16), w1_ref[...], preferred_element_type=f32) + b1_ref[...]
    h1 = jnp.maximum(h1, 0.0)
    f2 = jnp.dot(h1.astype(bf16), w2_ref[...], preferred_element_type=f32) + b2_ref[...]

    # ---- AddNorm 2 ------------------------------------------------------------
    out2 = _layernorm(y2 + f2, ln2w_ref[...], ln2b_ref[...])
    out_ref[...] = out2.reshape(Bt, S, H).astype(out_ref.dtype)


def transformer_encoder_block(x, valid_lens, params, num_heads, *, batch_tile=None):
    B, S, H = x.shape
    if batch_tile is None:
        batch_tile = B                 # whole batch per grid step at small sizes
    Bt = batch_tile
    assert B % Bt == 0, "batch must be divisible by batch_tile"

    # ---- one-time parameter packing / casting (outside the kernel) ----------
    wqkv = jnp.concatenate([params["wq"], params["wk"], params["wv"]],
                           axis=1).astype(jnp.bfloat16)                 # (H, 3H)
    wo = params["wo"].astype(jnp.bfloat16)
    w1 = params["w1"].astype(jnp.bfloat16)
    w2 = params["w2"].astype(jnp.bfloat16)
    vlen2d = valid_lens.astype(jnp.int32).reshape(B, 1)

    full2d = lambda arr: pl.BlockSpec(arr.shape, lambda b: (0, 0))       # resident weights
    kernel = functools.partial(_encoder_block_kernel, num_heads)

    return pl.pallas_call(
        kernel,
        out_shape=jax.ShapeDtypeStruct((B, S, H), x.dtype),
        grid_spec=pltpu.PrefetchScalarGridSpec(
            num_scalar_prefetch=0,
            grid=(B // Bt,),
            in_specs=[
                pl.BlockSpec((Bt, S, H), lambda b: (b, 0, 0)),           # x
                pl.BlockSpec((Bt, 1), lambda b: (b, 0)),                 # valid_lens
                full2d(wqkv), full2d(wo),
                full2d(params["ln1w"]), full2d(params["ln1b"]),
                full2d(w1), full2d(params["b1"]),
                full2d(w2), full2d(params["b2"]),
                full2d(params["ln2w"]), full2d(params["ln2b"]),
            ],
            out_specs=pl.BlockSpec((Bt, S, H), lambda b: (b, 0, 0)),
        ),
        compiler_params=pltpu.CompilerParams(dimension_semantics=("parallel",)),
    )(x, vlen2d, wqkv, wo,
      params["ln1w"], params["ln1b"],
      w1, params["b1"], w2, params["b2"],
      params["ln2w"], params["ln2b"])


def _reference(x, valid_lens, params, num_heads):
    """Pure-JAX f32 reference mirroring the PyTorch forward (dropout = identity)."""
    B, S, H = x.shape
    hd = H // num_heads
    q = x @ params["wq"]
    k = x @ params["wk"]
    v = x @ params["wv"]
    split = lambda t: t.reshape(B, S, num_heads, hd).transpose(0, 2, 1, 3)
    qh, kh, vh = split(q), split(k), split(v)
    scores = jnp.einsum("bhqd,bhkd->bhqk", qh, kh) / math.sqrt(hd)
    mask = jnp.arange(S)[None, None, None, :] < valid_lens[:, None, None, None]
    scores = jnp.where(mask, scores, -1.0e6)
    attn = jax.nn.softmax(scores, axis=-1)
    o = jnp.einsum("bhqk,bhkd->bhqd", attn, vh).transpose(0, 2, 1, 3).reshape(B, S, H)
    ao = o @ params["wo"]
    y = _layernorm(x + ao, params["ln1w"], params["ln1b"])
    f = jnp.maximum(y @ params["w1"] + params["b1"], 0.0) @ params["w2"] + params["b2"]
    return _layernorm(y + f, params["ln2w"], params["ln2b"])


if __name__ == "__main__":
    # Small shapes consistent with the module: query/key/value_size == num_hiddens.
    B, S, H = 2, 8, 32
    NUM_HEADS = 4
    FFN_HIDDENS = 64

    key = jax.random.PRNGKey(0)
    ks = jax.random.split(key, 8)
    scale = 0.02
    params = {
        "wq": scale * jax.random.normal(ks[0], (H, H), jnp.float32),
        "wk": scale * jax.random.normal(ks[1], (H, H), jnp.float32),
        "wv": scale * jax.random.normal(ks[2], (H, H), jnp.float32),
        "wo": scale * jax.random.normal(ks[3], (H, H), jnp.float32),
        "ln1w": jnp.ones((1, H), jnp.float32),
        "ln1b": jnp.zeros((1, H), jnp.float32),
        "w1": scale * jax.random.normal(ks[4], (H, FFN_HIDDENS), jnp.float32),
        "b1": 0.01 * jnp.ones((1, FFN_HIDDENS), jnp.float32),
        "w2": scale * jax.random.normal(ks[5], (FFN_HIDDENS, H), jnp.float32),
        "b2": 0.01 * jnp.ones((1, H), jnp.float32),
        "ln2w": jnp.ones((1, H), jnp.float32),
        "ln2b": jnp.zeros((1, H), jnp.float32),
    }

    x = jax.random.normal(ks[6], (B, S, H), jnp.float32)
    valid_lens = jnp.array([5, 8], dtype=jnp.int32)   # shape (bs,)

    out = transformer_encoder_block(x, valid_lens, params, NUM_HEADS)
    out = jax.block_until_ready(out)

    ref = _reference(x, valid_lens, params, NUM_HEADS)
    assert out.shape == (B, S, H)
    # bf16 MXU operands + approx reciprocal vs. the fp32 reference -> relaxed tolerance
    # (structural errors would be O(0.1-1), well above this).
    assert jnp.allclose(out, ref, atol=1e-2, rtol=1e-2), "mismatch vs JAX reference"

    print("KERNEL_OK")
</pallas_src>

<mosaic_0001>
module attributes {stable_mosaic.version = 11 : i64} {
  func.func @_encoder_block_kernel(%arg0: i32, %arg1: memref<2x8x32xf32, #tpu.memory_space<vmem>>, %arg2: memref<2x1xi32, #tpu.memory_space<vmem>>, %arg3: memref<32x96xbf16, #tpu.memory_space<vmem>>, %arg4: memref<32x32xbf16, #tpu.memory_space<vmem>>, %arg5: memref<1x32xf32, #tpu.memory_space<vmem>>, %arg6: memref<1x32xf32, #tpu.memory_space<vmem>>, %arg7: memref<32x64xbf16, #tpu.memory_space<vmem>>, %arg8: memref<1x64xf32, #tpu.memory_space<vmem>>, %arg9: memref<64x32xbf16, #tpu.memory_space<vmem>>, %arg10: memref<1x32xf32, #tpu.memory_space<vmem>>, %arg11: memref<1x32xf32, #tpu.memory_space<vmem>>, %arg12: memref<1x32xf32, #tpu.memory_space<vmem>>, %arg13: memref<2x8x32xf32, #tpu.memory_space<vmem>>) attributes {dimension_semantics = [#tpu.dimension_semantics<parallel>], iteration_bounds = array<i64: 1>, scalar_prefetch = 0 : i64, scratch_operands = 0 : i64, tpu.core_type = #tpu.core_type<tc>, window_params = [{transform_indices = @transform_0, window_bounds = array<i64: 2, 8, 32>}, {transform_indices = @transform_1, window_bounds = array<i64: 2, 1>}, {pipeline_mode = #tpu.pipeline_mode<synchronous>, transform_indices = @transform_2, window_bounds = array<i64: 32, 96>}, {pipeline_mode = #tpu.pipeline_mode<synchronous>, transform_indices = @transform_3, window_bounds = array<i64: 32, 32>}, {pipeline_mode = #tpu.pipeline_mode<synchronous>, transform_indices = @transform_4, window_bounds = array<i64: 1, 32>}, {pipeline_mode = #tpu.pipeline_mode<synchronous>, transform_indices = @transform_5, window_bounds = array<i64: 1, 32>}, {pipeline_mode = #tpu.pipeline_mode<synchronous>, transform_indices = @transform_6, window_bounds = array<i64: 32, 64>}, {pipeline_mode = #tpu.pipeline_mode<synchronous>, transform_indices = @transform_7, window_bounds = array<i64: 1, 64>}, {pipeline_mode = #tpu.pipeline_mode<synchronous>, transform_indices = @transform_8, window_bounds = array<i64: 64, 32>}, {pipeline_mode = #tpu.pipeline_mode<synchronous>, transform_indices = @transform_9, window_bounds = array<i64: 1, 32>}, {pipeline_mode = #tpu.pipeline_mode<synchronous>, transform_indices = @transform_10, window_bounds = array<i64: 1, 32>}, {pipeline_mode = #tpu.pipeline_mode<synchronous>, transform_indices = @transform_11, window_bounds = array<i64: 1, 32>}, {transform_indices = @transform_12, window_bounds = array<i64: 2, 8, 32>}]} {
    %c0 = arith.constant 0 : index
    %c0_0 = arith.constant 0 : index
    %c0_1 = arith.constant 0 : index
    %0 = vector.load %arg1[%c0, %c0_0, %c0_1] : memref<2x8x32xf32, #tpu.memory_space<vmem>>, vector<2x8x32xf32>
    %1 = vector.shape_cast %0 : vector<2x8x32xf32> to vector<16x32xf32>
    %2 = arith.truncf %1 : vector<16x32xf32> to vector<16x32xbf16>
    %c0_2 = arith.constant 0 : index
    %c0_3 = arith.constant 0 : index
    %3 = vector.load %arg3[%c0_2, %c0_3] : memref<32x96xbf16, #tpu.memory_space<vmem>>, vector<32x96xbf16>
    %cst = arith.constant dense<0.000000e+00> : vector<16x96xf32>
    %4 = tpu.matmul %2, %3, %cst {dimension_numbers = #tpu.dot_dimension_numbers<[1], [0], [0], [1], [0, 0, 1, 1], [], []>} : vector<16x32xbf16>, vector<32x96xbf16>, vector<16x96xf32> -> vector<16x96xf32>
    %5 = vector.extract_strided_slice %4 {offsets = [0, 0], sizes = [16, 32], strides = [1, 1]} : vector<16x96xf32> to vector<16x32xf32>
    %cst_4 = arith.constant 0.353553385 : f32
    %6 = vector.broadcast %cst_4 : f32 to vector<16x32xf32>
    %7 = arith.mulf %5, %6 : vector<16x32xf32>
    %8 = vector.shape_cast %7 : vector<16x32xf32> to vector<2x8x32xf32>
    %9 = vector.extract_strided_slice %4 {offsets = [0, 32], sizes = [16, 32], strides = [1, 1]} : vector<16x96xf32> to vector<16x32xf32>
    %10 = vector.shape_cast %9 : vector<16x32xf32> to vector<2x8x32xf32>
    %11 = vector.extract_strided_slice %4 {offsets = [0, 64], sizes = [16, 32], strides = [1, 1]} : vector<16x96xf32> to vector<16x32xf32>
    %12 = vector.shape_cast %11 : vector<16x32xf32> to vector<2x8x32xf32>
    %13 = tpu.iota {dimensions = array<i32: 2>} : vector<2x8x8xi32>
    %c0_5 = arith.constant 0 : index
    %c0_6 = arith.constant 0 : index
    %14 = vector.load %arg2[%c0_5, %c0_6] : memref<2x1xi32, #tpu.memory_space<vmem>>, vector<2x1xi32>
    %15 = vector.shape_cast %14 : vector<2x1xi32> to vector<2x1x1xi32>
    %16 = vector.broadcast %15 : vector<2x1x1xi32> to vector<2x8x8xi32>
    %17 = arith.cmpi slt, %13, %16 : vector<2x8x8xi32>
    %cst_7 = arith.constant 0.000000e+00 : f32
    %18 = vector.broadcast %cst_7 : f32 to vector<16x32xf32>
    %19 = vector.extract_strided_slice %8 {offsets = [0, 0, 0], sizes = [2, 8, 8], strides = [1, 1, 1]} : vector<2x8x32xf32> to vector<2x8x8xf32>
    %20 = arith.truncf %19 : vector<2x8x8xf32> to vector<2x8x8xbf16>
    %21 = vector.extract_strided_slice %10 {offsets = [0, 0, 0], sizes = [2, 8, 8], strides = [1, 1, 1]} : vector<2x8x32xf32> to vector<2x8x8xf32>
    %22 = arith.truncf %21 : vector<2x8x8xf32> to vector<2x8x8xbf16>
    %23 = vector.extract_strided_slice %12 {offsets = [0, 0, 0], sizes = [2, 8, 8], strides = [1, 1, 1]} : vector<2x8x32xf32> to vector<2x8x8xf32>
    %24 = arith.truncf %23 : vector<2x8x8xf32> to vector<2x8x8xbf16>
    "tpu.trace_start"() <{level = 10 : i32, message = "bqd,bkd->bqk"}> : () -> ()
    %cst_8 = arith.constant dense<0.000000e+00> : vector<2x8x8xf32>
    %25 = tpu.matmul %20, %22, %cst_8 {dimension_numbers = #tpu.dot_dimension_numbers<[2], [2], [1], [1], [0, 0, 0, 1, 1, 1], [0], [0]>} : vector<2x8x8xbf16>, vector<2x8x8xbf16>, vector<2x8x8xf32> -> vector<2x8x8xf32>
    %cst_9 = arith.constant -1.000000e+06 : f32
    "tpu.trace_stop"() : () -> ()
    %26 = vector.broadcast %cst_9 : f32 to vector<2x8x8xf32>
    %27 = arith.select %17, %25, %26 : vector<2x8x8xi1>, vector<2x8x8xf32>
    %cst_10 = arith.constant dense<0xFF800000> : vector<2x8xf32>
    %28 = vector.multi_reduction <maximumf>, %27, %cst_10 [2] : vector<2x8x8xf32> to vector<2x8xf32>
    %29 = vector.shape_cast %28 : vector<2x8xf32> to vector<2x8x1xf32>
    %30 = vector.broadcast %29 : vector<2x8x1xf32> to vector<2x8x8xf32>
    %31 = arith.subf %27, %30 : vector<2x8x8xf32>
    %32 = math.exp %31 : vector<2x8x8xf32>
    %cst_11 = arith.constant dense<0.000000e+00> : vector<2x8xf32>
    %33 = vector.multi_reduction <add>, %32, %cst_11 [2] : vector<2x8x8xf32> to vector<2x8xf32>
    %34 = vector.shape_cast %33 : vector<2x8xf32> to vector<2x8x1xf32>
    %35 = tpu.reciprocal %34 {approx = true} : vector<2x8x1xf32> -> vector<2x8x1xf32>
    %36 = vector.broadcast %35 : vector<2x8x1xf32> to vector<2x8x8xf32>
    %37 = arith.mulf %32, %36 : vector<2x8x8xf32>
    %38 = arith.truncf %37 : vector<2x8x8xf32> to vector<2x8x8xbf16>
    "tpu.trace_start"() <{level = 10 : i32, message = "bqk,bkd->bqd"}> : () -> ()
    %cst_12 = arith.constant dense<0.000000e+00> : vector<2x8x8xf32>
    %39 = tpu.matmul %38, %24, %cst_12 {dimension_numbers = #tpu.dot_dimension_numbers<[2], [1], [1], [2], [0, 0, 0, 1, 1, 2], [0], [0]>} : vector<2x8x8xbf16>, vector<2x8x8xbf16>, vector<2x8x8xf32> -> vector<2x8x8xf32>
    "tpu.trace_stop"() : () -> ()
    %40 = vector.shape_cast %39 : vector<2x8x8xf32> to vector<16x8xf32>
    %41 = arith.truncf %40 : vector<16x8xf32> to vector<16x8xbf16>
    %c0_13 = arith.constant 0 : index
    %c0_14 = arith.constant 0 : index
    %42 = vector.load %arg4[%c0_13, %c0_14] : memref<32x32xbf16, #tpu.memory_space<vmem>>, vector<8x32xbf16>
    %cst_15 = arith.constant dense<0.000000e+00> : vector<16x32xf32>
    %43 = tpu.matmul %41, %42, %cst_15 {dimension_numbers = #tpu.dot_dimension_numbers<[1], [0], [0], [1], [0, 0, 1, 1], [], []>} : vector<16x8xbf16>, vector<8x32xbf16>, vector<16x32xf32> -> vector<16x32xf32>
    %44 = arith.addf %18, %43 : vector<16x32xf32>
    %45 = vector.extract_strided_slice %8 {offsets = [0, 0, 8], sizes = [2, 8, 8], strides = [1, 1, 1]} : vector<2x8x32xf32> to vector<2x8x8xf32>
    %46 = arith.truncf %45 : vector<2x8x8xf32> to vector<2x8x8xbf16>
    %47 = vector.extract_strided_slice %10 {offsets = [0, 0, 8], sizes = [2, 8, 8], strides = [1, 1, 1]} : vector<2x8x32xf32> to vector<2x8x8xf32>
    %48 = arith.truncf %47 : vector<2x8x8xf32> to vector<2x8x8xbf16>
    %49 = vector.extract_strided_slice %12 {offsets = [0, 0, 8], sizes = [2, 8, 8], strides = [1, 1, 1]} : vector<2x8x32xf32> to vector<2x8x8xf32>
    %50 = arith.truncf %49 : vector<2x8x8xf32> to vector<2x8x8xbf16>
    "tpu.trace_start"() <{level = 10 : i32, message = "bqd,bkd->bqk"}> : () -> ()
    %cst_16 = arith.constant dense<0.000000e+00> : vector<2x8x8xf32>
    %51 = tpu.matmul %46, %48, %cst_16 {dimension_numbers = #tpu.dot_dimension_numbers<[2], [2], [1], [1], [0, 0, 0, 1, 1, 1], [0], [0]>} : vector<2x8x8xbf16>, vector<2x8x8xbf16>, vector<2x8x8xf32> -> vector<2x8x8xf32>
    %cst_17 = arith.constant -1.000000e+06 : f32
    "tpu.trace_stop"() : () -> ()
    %52 = vector.broadcast %cst_17 : f32 to vector<2x8x8xf32>
    %53 = arith.select %17, %51, %52 : vector<2x8x8xi1>, vector<2x8x8xf32>
    %cst_18 = arith.constant dense<0xFF800000> : vector<2x8xf32>
    %54 = vector.multi_reduction <maximumf>, %53, %cst_18 [2] : vector<2x8x8xf32> to vector<2x8xf32>
    %55 = vector.shape_cast %54 : vector<2x8xf32> to vector<2x8x1xf32>
    %56 = vector.broadcast %55 : vector<2x8x1xf32> to vector<2x8x8xf32>
    %57 = arith.subf %53, %56 : vector<2x8x8xf32>
    %58 = math.exp %57 : vector<2x8x8xf32>
    %cst_19 = arith.constant dense<0.000000e+00> : vector<2x8xf32>
    %59 = vector.multi_reduction <add>, %58, %cst_19 [2] : vector<2x8x8xf32> to vector<2x8xf32>
    %60 = vector.shape_cast %59 : vector<2x8xf32> to vector<2x8x1xf32>
    %61 = tpu.reciprocal %60 {approx = true} : vector<2x8x1xf32> -> vector<2x8x1xf32>
    %62 = vector.broadcast %61 : vector<2x8x1xf32> to vector<2x8x8xf32>
    %63 = arith.mulf %58, %62 : vector<2x8x8xf32>
    %64 = arith.truncf %63 : vector<2x8x8xf32> to vector<2x8x8xbf16>
    "tpu.trace_start"() <{level = 10 : i32, message = "bqk,bkd->bqd"}> : () -> ()
    %cst_20 = arith.constant dense<0.000000e+00> : vector<2x8x8xf32>
    %65 = tpu.matmul %64, %50, %cst_20 {dimension_numbers = #tpu.dot_dimension_numbers<[2], [1], [1], [2], [0, 0, 0, 1, 1, 2], [0], [0]>} : vector<2x8x8xbf16>, vector<2x8x8xbf16>, vector<2x8x8xf32> -> vector<2x8x8xf32>
    "tpu.trace_stop"() : () -> ()
    %66 = vector.shape_cast %65 : vector<2x8x8xf32> to vector<16x8xf32>
    %67 = arith.truncf %66 : vector<16x8xf32> to vector<16x8xbf16>
    %c8 = arith.constant 8 : index
    %c0_21 = arith.constant 0 : index
    %68 = vector.load %arg4[%c8, %c0_21] : memref<32x32xbf16, #tpu.memory_space<vmem>>, vector<8x32xbf16>
    %cst_22 = arith.constant dense<0.000000e+00> : vector<16x32xf32>
    %69 = tpu.matmul %67, %68, %cst_22 {dimension_numbers = #tpu.dot_dimension_numbers<[1], [0], [0], [1], [0, 0, 1, 1], [], []>} : vector<16x8xbf16>, vector<8x32xbf16>, vector<16x32xf32> -> vector<16x32xf32>
    %70 = arith.addf %44, %69 : vector<16x32xf32>
    %71 = vector.extract_strided_slice %8 {offsets = [0, 0, 16], sizes = [2, 8, 8], strides = [1, 1, 1]} : vector<2x8x32xf32> to vector<2x8x8xf32>
    %72 = arith.truncf %71 : vector<2x8x8xf32> to vector<2x8x8xbf16>
    %73 = vector.extract_strided_slice %10 {offsets = [0, 0, 16], sizes = [2, 8, 8], strides = [1, 1, 1]} : vector<2x8x32xf32> to vector<2x8x8xf32>
    %74 = arith.truncf %73 : vector<2x8x8xf32> to vector<2x8x8xbf16>
    %75 = vector.extract_strided_slice %12 {offsets = [0, 0, 16], sizes = [2, 8, 8], strides = [1, 1, 1]} : vector<2x8x32xf32> to vector<2x8x8xf32>
    %76 = arith.truncf %75 : vector<2x8x8xf32> to vector<2x8x8xbf16>
    "tpu.trace_start"() <{level = 10 : i32, message = "bqd,bkd->bqk"}> : () -> ()
    %cst_23 = arith.constant dense<0.000000e+00> : vector<2x8x8xf32>
    %77 = tpu.matmul %72, %74, %cst_23 {dimension_numbers = #tpu.dot_dimension_numbers<[2], [2], [1], [1], [0, 0, 0, 1, 1, 1], [0], [0]>} : vector<2x8x8xbf16>, vector<2x8x8xbf16>, vector<2x8x8xf32> -> vector<2x8x8xf32>
    %cst_24 = arith.constant -1.000000e+06 : f32
    "tpu.trace_stop"() : () -> ()
    %78 = vector.broadcast %cst_24 : f32 to vector<2x8x8xf32>
    %79 = arith.select %17, %77, %78 : vector<2x8x8xi1>, vector<2x8x8xf32>
    %cst_25 = arith.constant dense<0xFF800000> : vector<2x8xf32>
    %80 = vector.multi_reduction <maximumf>, %79, %cst_25 [2] : vector<2x8x8xf32> to vector<2x8xf32>
    %81 = vector.shape_cast %80 : vector<2x8xf32> to vector<2x8x1xf32>
    %82 = vector.broadcast %81 : vector<2x8x1xf32> to vector<2x8x8xf32>
    %83 = arith.subf %79, %82 : vector<2x8x8xf32>
    %84 = math.exp %83 : vector<2x8x8xf32>
    %cst_26 = arith.constant dense<0.000000e+00> : vector<2x8xf32>
    %85 = vector.multi_reduction <add>, %84, %cst_26 [2] : vector<2x8x8xf32> to vector<2x8xf32>
    %86 = vector.shape_cast %85 : vector<2x8xf32> to vector<2x8x1xf32>
    %87 = tpu.reciprocal %86 {approx = true} : vector<2x8x1xf32> -> vector<2x8x1xf32>
    %88 = vector.broadcast %87 : vector<2x8x1xf32> to vector<2x8x8xf32>
    %89 = arith.mulf %84, %88 : vector<2x8x8xf32>
    %90 = arith.truncf %89 : vector<2x8x8xf32> to vector<2x8x8xbf16>
    "tpu.trace_start"() <{level = 10 : i32, message = "bqk,bkd->bqd"}> : () -> ()
    %cst_27 = arith.constant dense<0.000000e+00> : vector<2x8x8xf32>
    %91 = tpu.matmul %90, %76, %cst_27 {dimension_numbers = #tpu.dot_dimension_numbers<[2], [1], [1], [2], [0, 0, 0, 1, 1, 2], [0], [0]>} : vector<2x8x8xbf16>, vector<2x8x8xbf16>, vector<2x8x8xf32> -> vector<2x8x8xf32>
    "tpu.trace_stop"() : () -> ()
    %92 = vector.shape_cast %91 : vector<2x8x8xf32> to vector<16x8xf32>
    %93 = arith.truncf %92 : vector<16x8xf32> to vector<16x8xbf16>
    %c16 = arith.constant 16 : index
    %c0_28 = arith.constant 0 : index
    %94 = vector.load %arg4[%c16, %c0_28] : memref<32x32xbf16, #tpu.memory_space<vmem>>, vector<8x32xbf16>
    %cst_29 = arith.constant dense<0.000000e+00> : vector<16x32xf32>
    %95 = tpu.matmul %93, %94, %cst_29 {dimension_numbers = #tpu.dot_dimension_numbers<[1], [0], [0], [1], [0, 0, 1, 1], [], []>} : vector<16x8xbf16>, vector<8x32xbf16>, vector<16x32xf32> -> vector<16x32xf32>
    %96 = arith.addf %70, %95 : vector<16x32xf32>
    %97 = vector.extract_strided_slice %8 {offsets = [0, 0, 24], sizes = [2, 8, 8], strides = [1, 1, 1]} : vector<2x8x32xf32> to vector<2x8x8xf32>
    %98 = arith.truncf %97 : vector<2x8x8xf32> to vector<2x8x8xbf16>
    %99 = vector.extract_strided_slice %10 {offsets = [0, 0, 24], sizes = [2, 8, 8], strides = [1, 1, 1]} : vector<2x8x32xf32> to vector<2x8x8xf32>
    %100 = arith.truncf %99 : vector<2x8x8xf32> to vector<2x8x8xbf16>
    %101 = vector.extract_strided_slice %12 {offsets = [0, 0, 24], sizes = [2, 8, 8], strides = [1, 1, 1]} : vector<2x8x32xf32> to vector<2x8x8xf32>
    %102 = arith.truncf %101 : vector<2x8x8xf32> to vector<2x8x8xbf16>
    "tpu.trace_start"() <{level = 10 : i32, message = "bqd,bkd->bqk"}> : () -> ()
    %cst_30 = arith.constant dense<0.000000e+00> : vector<2x8x8xf32>
    %103 = tpu.matmul %98, %100, %cst_30 {dimension_numbers = #tpu.dot_dimension_numbers<[2], [2], [1], [1], [0, 0, 0, 1, 1, 1], [0], [0]>} : vector<2x8x8xbf16>, vector<2x8x8xbf16>, vector<2x8x8xf32> -> vector<2x8x8xf32>
    %cst_31 = arith.constant -1.000000e+06 : f32
    "tpu.trace_stop"() : () -> ()
    %104 = vector.broadcast %cst_31 : f32 to vector<2x8x8xf32>
    %105 = arith.select %17, %103, %104 : vector<2x8x8xi1>, vector<2x8x8xf32>
    %cst_32 = arith.constant dense<0xFF800000> : vector<2x8xf32>
    %106 = vector.multi_reduction <maximumf>, %105, %cst_32 [2] : vector<2x8x8xf32> to vector<2x8xf32>
    %107 = vector.shape_cast %106 : vector<2x8xf32> to vector<2x8x1xf32>
    %108 = vector.broadcast %107 : vector<2x8x1xf32> to vector<2x8x8xf32>
    %109 = arith.subf %105, %108 : vector<2x8x8xf32>
    %110 = math.exp %109 : vector<2x8x8xf32>
    %cst_33 = arith.constant dense<0.000000e+00> : vector<2x8xf32>
    %111 = vector.multi_reduction <add>, %110, %cst_33 [2] : vector<2x8x8xf32> to vector<2x8xf32>
    %112 = vector.shape_cast %111 : vector<2x8xf32> to vector<2x8x1xf32>
    %113 = tpu.reciprocal %112 {approx = true} : vector<2x8x1xf32> -> vector<2x8x1xf32>
    %114 = vector.broadcast %113 : vector<2x8x1xf32> to vector<2x8x8xf32>
    %115 = arith.mulf %110, %114 : vector<2x8x8xf32>
    %116 = arith.truncf %115 : vector<2x8x8xf32> to vector<2x8x8xbf16>
    "tpu.trace_start"() <{level = 10 : i32, message = "bqk,bkd->bqd"}> : () -> ()
    %cst_34 = arith.constant dense<0.000000e+00> : vector<2x8x8xf32>
    %117 = tpu.matmul %116, %102, %cst_34 {dimension_numbers = #tpu.dot_dimension_numbers<[2], [1], [1], [2], [0, 0, 0, 1, 1, 2], [0], [0]>} : vector<2x8x8xbf16>, vector<2x8x8xbf16>, vector<2x8x8xf32> -> vector<2x8x8xf32>
    "tpu.trace_stop"() : () -> ()
    %118 = vector.shape_cast %117 : vector<2x8x8xf32> to vector<16x8xf32>
    %119 = arith.truncf %118 : vector<16x8xf32> to vector<16x8xbf16>
    %c24 = arith.constant 24 : index
    %c0_35 = arith.constant 0 : index
    %120 = vector.load %arg4[%c24, %c0_35] : memref<32x32xbf16, #tpu.memory_space<vmem>>, vector<8x32xbf16>
    %cst_36 = arith.constant dense<0.000000e+00> : vector<16x32xf32>
    %121 = tpu.matmul %119, %120, %cst_36 {dimension_numbers = #tpu.dot_dimension_numbers<[1], [0], [0], [1], [0, 0, 1, 1], [], []>} : vector<16x8xbf16>, vector<8x32xbf16>, vector<16x32xf32> -> vector<16x32xf32>
    %122 = arith.addf %96, %121 : vector<16x32xf32>
    %123 = arith.addf %1, %122 : vector<16x32xf32>
    %c0_37 = arith.constant 0 : index
    %c0_38 = arith.constant 0 : index
    %124 = vector.load %arg5[%c0_37, %c0_38] : memref<1x32xf32, #tpu.memory_space<vmem>>, vector<1x32xf32>
    %c0_39 = arith.constant 0 : index
    %c0_40 = arith.constant 0 : index
    %125 = vector.load %arg6[%c0_39, %c0_40] : memref<1x32xf32, #tpu.memory_space<vmem>>, vector<1x32xf32>
    %cst_41 = arith.constant dense<0.000000e+00> : vector<16xf32>
    %126 = vector.multi_reduction <add>, %123, %cst_41 [1] : vector<16x32xf32> to vector<16xf32>
    %127 = vector.shape_cast %126 : vector<16xf32> to vector<16x1xf32>
    %cst_42 = arith.constant 3.200000e+01 : f32
    %128 = vector.broadcast %cst_42 : f32 to vector<16x1xf32>
    %129 = arith.divf %127, %128 : vector<16x1xf32>
    %130 = vector.broadcast %129 : vector<16x1xf32> to vector<16x32xf32>
    %131 = arith.subf %123, %130 : vector<16x32xf32>
    %132 = vector.broadcast %129 : vector<16x1xf32> to vector<16x32xf32>
    %133 = arith.subf %123, %132 : vector<16x32xf32>
    %134 = arith.mulf %131, %133 : vector<16x32xf32>
    %cst_43 = arith.constant dense<0.000000e+00> : vector<16xf32>
    %135 = vector.multi_reduction <add>, %134, %cst_43 [1] : vector<16x32xf32> to vector<16xf32>
    %136 = vector.shape_cast %135 : vector<16xf32> to vector<16x1xf32>
    %cst_44 = arith.constant 3.200000e+01 : f32
    %137 = vector.broadcast %cst_44 : f32 to vector<16x1xf32>
    %138 = arith.divf %136, %137 : vector<16x1xf32>
    %139 = vector.broadcast %129 : vector<16x1xf32> to vector<16x32xf32>
    %140 = arith.subf %123, %139 : vector<16x32xf32>
    %cst_45 = arith.constant 9.99999974E-6 : f32
    %141 = vector.broadcast %cst_45 : f32 to vector<16x1xf32>
    %142 = arith.addf %138, %141 : vector<16x1xf32>
    %143 = math.rsqrt %142 : vector<16x1xf32>
    %144 = vector.broadcast %143 : vector<16x1xf32> to vector<16x32xf32>
    %145 = arith.mulf %140, %144 : vector<16x32xf32>
    %146 = vector.broadcast %124 : vector<1x32xf32> to vector<16x32xf32>
    %147 = arith.mulf %145, %146 : vector<16x32xf32>
    %148 = vector.broadcast %125 : vector<1x32xf32> to vector<16x32xf32>
    %149 = arith.addf %147, %148 : vector<16x32xf32>
    %150 = arith.truncf %149 : vector<16x32xf32> to vector<16x32xbf16>
    %c0_46 = arith.constant 0 : index
    %c0_47 = arith.constant 0 : index
    %151 = vector.load %arg7[%c0_46, %c0_47] : memref<32x64xbf16, #tpu.memory_space<vmem>>, vector<32x64xbf16>
    %cst_48 = arith.constant dense<0.000000e+00> : vector<16x64xf32>
    %152 = tpu.matmul %150, %151, %cst_48 {dimension_numbers = #tpu.dot_dimension_numbers<[1], [0], [0], [1], [0, 0, 1, 1], [], []>} : vector<16x32xbf16>, vector<32x64xbf16>, vector<16x64xf32> -> vector<16x64xf32>
    %c0_49 = arith.constant 0 : index
    %c0_50 = arith.constant 0 : index
    %153 = vector.load %arg8[%c0_49, %c0_50] : memref<1x64xf32, #tpu.memory_space<vmem>>, vector<1x64xf32>
    %154 = vector.broadcast %153 : vector<1x64xf32> to vector<16x64xf32>
    %155 = arith.addf %152, %154 : vector<16x64xf32>
    %cst_51 = arith.constant 0.000000e+00 : f32
    %156 = vector.broadcast %cst_51 : f32 to vector<16x64xf32>
    %157 = arith.maximumf %155, %156 : vector<16x64xf32>
    %158 = arith.truncf %157 : vector<16x64xf32> to vector<16x64xbf16>
    %c0_52 = arith.constant 0 : index
    %c0_53 = arith.constant 0 : index
    %159 = vector.load %arg9[%c0_52, %c0_53] : memref<64x32xbf16, #tpu.memory_space<vmem>>, vector<64x32xbf16>
    %cst_54 = arith.constant dense<0.000000e+00> : vector<16x32xf32>
    %160 = tpu.matmul %158, %159, %cst_54 {dimension_numbers = #tpu.dot_dimension_numbers<[1], [0], [0], [1], [0, 0, 1, 1], [], []>} : vector<16x64xbf16>, vector<64x32xbf16>, vector<16x32xf32> -> vector<16x32xf32>
    %c0_55 = arith.constant 0 : index
    %c0_56 = arith.constant 0 : index
    %161 = vector.load %arg10[%c0_55, %c0_56] : memref<1x32xf32, #tpu.memory_space<vmem>>, vector<1x32xf32>
    %162 = vector.broadcast %161 : vector<1x32xf32> to vector<16x32xf32>
    %163 = arith.addf %160, %162 : vector<16x32xf32>
    %164 = arith.addf %149, %163 : vector<16x32xf32>
    %c0_57 = arith.constant 0 : index
    %c0_58 = arith.constant 0 : index
    %165 = vector.load %arg11[%c0_57, %c0_58] : memref<1x32xf32, #tpu.memory_space<vmem>>, vector<1x32xf32>
    %c0_59 = arith.constant 0 : index
    %c0_60 = arith.constant 0 : index
    %166 = vector.load %arg12[%c0_59, %c0_60] : memref<1x32xf32, #tpu.memory_space<vmem>>, vector<1x32xf32>
    %cst_61 = arith.constant dense<0.000000e+00> : vector<16xf32>
    %167 = vector.multi_reduction <add>, %164, %cst_61 [1] : vector<16x32xf32> to vector<16xf32>
    %168 = vector.shape_cast %167 : vector<16xf32> to vector<16x1xf32>
    %cst_62 = arith.constant 3.200000e+01 : f32
    %169 = vector.broadcast %cst_62 : f32 to vector<16x1xf32>
    %170 = arith.divf %168, %169 : vector<16x1xf32>
    %171 = vector.broadcast %170 : vector<16x1xf32> to vector<16x32xf32>
    %172 = arith.subf %164, %171 : vector<16x32xf32>
    %173 = vector.broadcast %170 : vector<16x1xf32> to vector<16x32xf32>
    %174 = arith.subf %164, %173 : vector<16x32xf32>
    %175 = arith.mulf %172, %174 : vector<16x32xf32>
    %cst_63 = arith.constant dense<0.000000e+00> : vector<16xf32>
    %176 = vector.multi_reduction <add>, %175, %cst_63 [1] : vector<16x32xf32> to vector<16xf32>
    %177 = vector.shape_cast %176 : vector<16xf32> to vector<16x1xf32>
    %cst_64 = arith.constant 3.200000e+01 : f32
    %178 = vector.broadcast %cst_64 : f32 to vector<16x1xf32>
    %179 = arith.divf %177, %178 : vector<16x1xf32>
    %180 = vector.broadcast %170 : vector<16x1xf32> to vector<16x32xf32>
    %181 = arith.subf %164, %180 : vector<16x32xf32>
    %cst_65 = arith.constant 9.99999974E-6 : f32
    %182 = vector.broadcast %cst_65 : f32 to vector<16x1xf32>
    %183 = arith.addf %179, %182 : vector<16x1xf32>
    %184 = math.rsqrt %183 : vector<16x1xf32>
    %185 = vector.broadcast %184 : vector<16x1xf32> to vector<16x32xf32>
    %186 = arith.mulf %181, %185 : vector<16x32xf32>
    %187 = vector.broadcast %165 : vector<1x32xf32> to vector<16x32xf32>
    %188 = arith.mulf %186, %187 : vector<16x32xf32>
    %189 = vector.broadcast %166 : vector<1x32xf32> to vector<16x32xf32>
    %190 = arith.addf %188, %189 : vector<16x32xf32>
    %191 = vector.shape_cast %190 : vector<16x32xf32> to vector<2x8x32xf32>
    %c0_66 = arith.constant 0 : index
    %c0_67 = arith.constant 0 : index
    %c0_68 = arith.constant 0 : index
    %192 = vector.load %arg13[%c0_66, %c0_67, %c0_68] : memref<2x8x32xf32, #tpu.memory_space<vmem>>, vector<2x8x32xf32>
    tpu.vector_store %arg13[%c0_66, %c0_67, %c0_68], %191 {strides = array<i32>} : memref<2x8x32xf32, #tpu.memory_space<vmem>>, vector<2x8x32xf32>,
    return
  }
  func.func @transform_0(%arg0: i32) -> (i32, i32, i32) {
    %c0_i32 = arith.constant 0 : i32
    %c0_i32_0 = arith.constant 0 : i32
    %c0_i32_1 = arith.constant 0 : i32
    return %arg0, %c0_i32, %c0_i32_0 : i32, i32, i32
  }
  func.func @transform_1(%arg0: i32) -> (i32, i32) {
    %c0_i32 = arith.constant 0 : i32
    %c0_i32_0 = arith.constant 0 : i32
    return %arg0, %c0_i32 : i32, i32
  }
  func.func @transform_2(%arg0: i32) -> (i32, i32) {
    %c0_i32 = arith.constant 0 : i32
    %c0_i32_0 = arith.constant 0 : i32
    %c0_i32_1 = arith.constant 0 : i32
    return %c0_i32, %c0_i32_0 : i32, i32
  }
  func.func @transform_3(%arg0: i32) -> (i32, i32) {
    %c0_i32 = arith.constant 0 : i32
    %c0_i32_0 = arith.constant 0 : i32
    %c0_i32_1 = arith.constant 0 : i32
    return %c0_i32, %c0_i32_0 : i32, i32
  }
  func.func @transform_4(%arg0: i32) -> (i32, i32) {
    %c0_i32 = arith.constant 0 : i32
    %c0_i32_0 = arith.constant 0 : i32
    %c0_i32_1 = arith.constant 0 : i32
    return %c0_i32, %c0_i32_0 : i32, i32
  }
  func.func @transform_5(%arg0: i32) -> (i32, i32) {
    %c0_i32 = arith.constant 0 : i32
    %c0_i32_0 = arith.constant 0 : i32
    %c0_i32_1 = arith.constant 0 : i32
    return %c0_i32, %c0_i32_0 : i32, i32
  }
  func.func @transform_6(%arg0: i32) -> (i32, i32) {
    %c0_i32 = arith.constant 0 : i32
    %c0_i32_0 = arith.constant 0 : i32
    %c0_i32_1 = arith.constant 0 : i32
    return %c0_i32, %c0_i32_0 : i32, i32
  }
  func.func @transform_7(%arg0: i32) -> (i32, i32) {
    %c0_i32 = arith.constant 0 : i32
    %c0_i32_0 = arith.constant 0 : i32
    %c0_i32_1 = arith.constant 0 : i32
    return %c0_i32, %c0_i32_0 : i32, i32
  }
  func.func @transform_8(%arg0: i32) -> (i32, i32) {
    %c0_i32 = arith.constant 0 : i32
    %c0_i32_0 = arith.constant 0 : i32
    %c0_i32_1 = arith.constant 0 : i32
    return %c0_i32, %c0_i32_0 : i32, i32
  }
  func.func @transform_9(%arg0: i32) -> (i32, i32) {
    %c0_i32 = arith.constant 0 : i32
    %c0_i32_0 = arith.constant 0 : i32
    %c0_i32_1 = arith.constant 0 : i32
    return %c0_i32, %c0_i32_0 : i32, i32
  }
  func.func @transform_10(%arg0: i32) -> (i32, i32) {
    %c0_i32 = arith.constant 0 : i32
    %c0_i32_0 = arith.constant 0 : i32
    %c0_i32_1 = arith.constant 0 : i32
    return %c0_i32, %c0_i32_0 : i32, i32
  }
  func.func @transform_11(%arg0: i32) -> (i32, i32) {
    %c0_i32 = arith.constant 0 : i32
    %c0_i32_0 = arith.constant 0 : i32
    %c0_i32_1 = arith.constant 0 : i32
    return %c0_i32, %c0_i32_0 : i32, i32
  }
  func.func @transform_12(%arg0: i32) -> (i32, i32, i32) {
    %c0_i32 = arith.constant 0 : i32
    %c0_i32_0 = arith.constant 0 : i32
    %c0_i32_1 = arith.constant 0 : i32
    return %arg0, %c0_i32, %c0_i32_0 : i32, i32, i32
  }
}

</mosaic_0001>

<bundles_post_ra>
// kernel: tpu_custom_call.1
= control target key start
LH: loop header
LB: loop body
LE: loop exit
PB: predicated region body
PF: predicated region fallthrough
CT: control target
= control target key end

     0   :  { %17 = vsyncpa [#allocation3], 0  ;;  %s2339_s0 = inlined_call_operand.vmem [shape: f32[2,8,32], index: 0, kind: input, shape index: {}]   ;;  %s2340_s1 = inlined_call_operand.vmem [shape: s32[2,1], index: 1, kind: input, shape index: {}]   ;;  %s2341_s2 = inlined_call_operand.vmem [shape: bf16[32,96], index: 2, kind: input, shape index: {}]   ;;  %s2342_s3 = inlined_call_operand.vmem [shape: bf16[32,32], index: 3, kind: input, shape index: {}]   ;;  %s2343_s4 = inlined_call_operand.vmem [shape: f32[1,32], index: 4, kind: input, shape index: {}]   ;;  %s2344_s5 = inlined_call_operand.hbm [shape: f32[1,32], index: 5, kind: input, shape index: {}]   ;;  %s2345_s6 = inlined_call_operand.hbm [shape: bf16[32,64], index: 6, kind: input, shape index: {}]   ;;  %s2346_s7 = inlined_call_operand.hbm [shape: f32[1,64], index: 7, kind: input, shape index: {}]   ;;  %s2347_s8 = inlined_call_operand.vmem [shape: bf16[64,32], index: 8, kind: input, shape index: {}]   ;;  %s2348_s9 = inlined_call_operand.vmem [shape: f32[1,32], index: 9, kind: input, shape index: {}]   ;;  %s2349_s10 = inlined_call_operand.vmem [shape: f32[1,32], index: 10, kind: input, shape index: {}]   ;;  %s2350_s11 = inlined_call_operand.vmem [shape: f32[1,32], index: 11, kind: input, shape index: {}]   ;;  %s2351_s12 = inlined_call_operand.hbm [shape: f32[2,8,32], index: 12, kind: output, shape index: {}]  }
   0x1   :  { %18 = vsyncpa [#allocation6], 0 }
   0x2   :  { %19 = vsyncpa [#allocation4], 0  ;;  %s1944_s21 = smov [#allocation5]  }
   0x3   :  { %s45_s22 = sshll.u32 %s1944_s21, 4  ;;  %s46_s22 = int_to_ptr.vmem [resolvable:$true] %s45_s22 }
   0x4   :  { %s1866_s23 = scalar_lea.vmem %s46_s22, 256  ;;  %p1871_p1 = scmp.lt.s32.totalorder %s46_s22, %s46_s22 }
   0x5   :  { %p1867_p0 = scmp.ne.s32.totalorder %s46_s22, %s1866_s23  ;;  %p1872_p2 = scmp.lt.s32.totalorder %s1866_s23, %s1866_s23 }
   0x7   :  { %p1873_p3 = por %p1872_p2, %p1871_p1 }
   0x9   :  { %p1874_p4 = pnand %p1873_p3, %p1867_p0 }
   0xb   :  { %1877 = shalt.err (!%p1874_p4)
}
   0xc   :  { %s1945_s24 = smov 64   ;;  %s1946_s25 = smov 4  }
   0xd   :  { %51 = dma.hbm_to_vmem [thread:$0]  %s2345_s6, 256, %s46_s22, [#allocation6], %s1945_s24, %s1945_s24, %s1946_s25  }
   0xe   :  { %s1947_s28 = smov [#allocation2]   ;;  %s1948_s30 = smov [#allocation7]  }
   0xf   :  { %s36_s29 = sshll.u32 %s1947_s28, 4  ;;  %s58_s13 = sshll.u32 %s1948_s30, 4  ;;  %s37_s29 = int_to_ptr.vmem [resolvable:$true] %s36_s29  ;;  %s59_s13 = int_to_ptr.vmem [resolvable:$true] %s58_s13 }
  0x10   :  { %s1886_s14 = scalar_lea.vmem %s37_s29, 16  ;;  %s1890_s15 = scalar_lea.vmem %s37_s29, 32 }
  0x11   :  { %p1887_p5 = scmp.ne.s32.totalorder %s37_s29, %s1886_s14  ;;  %p1891_p6 = scmp.lt.s32.totalorder %s37_s29, %s37_s29 }
  0x12   :  { %p1892_p7 = scmp.lt.s32.totalorder %s1890_s15, %s1886_s14 }
  0x14   :  { %p1893_p8 = por %p1892_p7, %p1891_p6 }
  0x16   :  { %p1894_p9 = pnand %p1893_p8, %p1887_p5 }
  0x18   :  { %1897 = shalt.err (!%p1894_p9)
}
  0x19   :  { %39 = dma.hbm_to_vmem [thread:$0]  %s2344_s5, 16, %s37_s29, [#allocation3]  }
  0x1a   :  { %s1906_s18 = scalar_lea.vmem %s59_s13, 16  ;;  %s1910_s6 = scalar_lea.vmem %s59_s13, 32 }
  0x1b   :  { %p1907_p10 = scmp.ne.s32.totalorder %s59_s13, %s1906_s18  ;;  %p1911_p11 = scmp.lt.s32.totalorder %s59_s13, %s59_s13 }
  0x1c   :  { %p1912_p12 = scmp.lt.s32.totalorder %s1910_s6, %s1906_s18 }
  0x1e   :  { %p1913_p13 = por %p1912_p12, %p1911_p11 }
  0x20   :  { %p1914_p0 = pnand %p1913_p13, %p1907_p10 }
  0x22   :  { %1917 = shalt.err (!%p1914_p0)
}
  0x23   :  { %61 = dma.hbm_to_vmem [thread:$0]  %s2346_s7, 16, %s59_s13, [#allocation6]  }
  0x24   :  { %1938 = dma.done.wait [#allocation3], 16  }
  0x25   :  { %1939 = vsyncadd [#allocation3], 4294967280 }
  0x26   :  { %1940 = dma.done.wait [#allocation6], 272  }
  0x27   :  { %1941 = vsyncadd [#allocation6], 4294967024  ;;  %v1949_v0 = vmov 0.0   ;;  %vm1950_vm0 = vmmov 0   ;;  %v1810_v1 = vld [vmem:[%s2341_s2 + $0x8] sm:$0xff]   ;;  %v1811_v2 = vld [vmem:[%s2341_s2] sm:$0xff]   ;;  %v146_v9 = vlaneseq }
  0x28   :  { %1638 = vmatprep.subr.bf16.mxu1 %v1949_v0  ;;  %1642 = vmatprep.mubr.msk.bf16.mxu1 %vm1950_vm0, %v1949_v0  ;;  %v2057_v3 = vld [vmem:[%s2339_s0] sm:$0xff]  ;;  %v2062_v4 = vld [vmem:[%s2339_s0 + $0x8] sm:$0xff]  ;;  %vm99_vm1 = vcmask 261120   ;;  %s1951_s0 = smov 96   ;;  %v1952_v10 = vmov 0   ;;  %vm194_vm2 = vcmask 64512  }
  0x29   :  { %1652 = vmatprep.subr.bf16.mxu0 %v1949_v0  ;;  %1654 = vmatprep.mubr.msk.bf16.mxu0 %vm1950_vm0, %v1949_v0  ;;  %v82_v5 = vpack.c.bf16 %v2062_v4, %v2057_v3  ;;  %v1953_v12 = vmov 1966171168   ;;  %v161_v14 = vshrl.u32 %v146_v9, 7  ;;  %v2096_v34 = vand.u32 127, %v146_v9  ;;  %s1955_s29 = smov 120   ;;  %s1957_s30 = smov 80  }
  0x2a   :  { %1639 = vmatpush3.bf16.msra.mxu1 %v1810_v1  ;;  %1808 = vset.pattern.permute.xlu1 %v1952_v10  ;;  %v158_v13 = vunpack.c.l.s4 %v1953_v12  ;;  %v1552_v16 = vld.sshfl [vmem:[%s2340_s1] sm:$0x11 pattern:$0x75316420]  ;;  %s1954_s1 = smov 88   ;;  %vm321_vm5 = vcmask 1043456  }
  0x2b   :  { %1640 = vmatprep.subr.bf16.mxu1 %v1949_v0  ;;  %1809 = vset.pattern.permute.xlu0 %v1952_v10  ;;  %v156_v19 = vcombine.high %v1552_v16, %v1552_v16  ;;  %v173_v21 = vsub.s32 0, %v161_v14  ;;  %s1958_s13 = smov 112   ;;  %s1959_s18 = smov 48   ;;  %vm1438_vm6 = vcmask 523264  }
  0x2c   :  { %v159_v18 = vunpack.c.0.s8 %v158_v13  ;;  %s1960_s6 = smov 72   ;;  %s1961_s19 = smov 104  }
  0x2d   :  { %s1962_s21 = smov 40   ;;  %s1963_s14 = smov [#allocation8]  }
  0x2e   :  { %1641 = vmatpush3.bf16.msra.mxu1 %v1811_v2  ;;  %v162_v20 = vsub.s32 %v159_v18, %v161_v14  ;;  %s1536_s15 = sshll.u32 %s1963_s14, 4  ;;  %s1537_s15 = int_to_ptr.vmem [resolvable:$true] %s1536_s15 }
  0x2f   :  { %1646 = vmatprep.subr.bf16.mxu1 %v1949_v0  ;;  %s1918_s16 = scalar_lea.vmem %s1537_s15, 256  ;;  %p1923_p2 = scmp.lt.s32.totalorder %s1537_s15, %s1537_s15 }
  0x30   :  { %v163_v22 = vrot.slane %v1552_v16, %v162_v20  ;;  %v170_v23 = vrot.slane %v156_v19, %v162_v20  ;;  %p1919_p1 = scmp.ne.s32.totalorder %s1537_s15, %s1918_s16  ;;  %p1924_p3 = scmp.lt.s32.totalorder %s1918_s16, %s1918_s16 }
  0x31   :  { %1643 = vmatmul.mubr.msk.bf16.vlgmr.msra.gmra.mxu1 %vm99_vm1, %v82_v5 }
  0x32   :  { %1648 = vmatprep.mubr.msk.bf16.mxu1 %vm1950_vm0, %v1949_v0  ;;  %v174_v24 = vrot.slane %v163_v22, %v173_v21  ;;  %v178_v25 = vrot.slane %v170_v23, %v173_v21  ;;  %p1925_p4 = por %p1924_p3, %p1923_p2 }
  0x34   :  { %180 = vperm.xlu1 %1808, %v174_v24   ;;  %p1926_p5 = pnand %p1925_p4, %p1919_p1 }
  0x38   :  { %183 = vperm.xlu1 %1808, %v178_v25  }
  0xaf   :  { %v2098_v35 = vpop.permute.xlu1 %180 }
  0xb0   :  { %vm185_vm3 = vcmp.lt.s32.totalorder %v2096_v34, %v2098_v35 }
  0xb3   :  { %v2102_v37 = vpop.permute.xlu1 %183 }
  0xb4   :  { %vm186_vm4 = vcmp.lt.s32.totalorder %v2096_v34, %v2102_v37 }
  0xf1   :  { %v137_v6 = vpop.f32.mrf.mxu1 }
  0xf2   :  { %v2071_v7 = vpack.c.bf16 %v137_v6, %v137_v6  ;;  %v144_v28 = vmul.f32 0.35355338, %v137_v6 }
  0xf3   :  { %v1644_v8 = vpop.f32.mrf.mxu1 }
  0xf4   :  { %192 = vrot.lane.b32.xlu0 %v2071_v7, %s1951_s0  ;;  %v2083_v31 = vpack.c.bf16 %v144_v28, %v144_v28 }
  0xf5   :  { %v140_v11 = vpop.f32.mrf.mxu1 }
  0xf6   :  { %v2074_v15 = vpack.c.bf16 %v140_v11, %v140_v11  ;;  %v145_v32 = vmul.f32 0.35355338, %v140_v11 }
  0xf7   :  { %v1645_v17 = vpop.f32.mrf.mxu1 }
  0xf8   :  { %242 = vrot.lane.b32.xlu0 %v2074_v15, %s1951_s0  ;;  %v2090_v33 = vpack.c.bf16 %v145_v32, %v145_v32 }
 0x166   :  { %v193_v26 = vpop.permute.xlu0 %192 }
 0x167   :  { %v199_v27 = vsel %vm194_vm2, %v193_v26, 0 }
 0x168   :  { %1647 = vmatpush3.bf16.xpose.msra.mxu1 %v199_v27 }
 0x169   :  { %1658 = vmatprep.subr.bf16.mxu1 %v1949_v0 }
 0x16a   :  { %v243_v29 = vpop.permute.xlu0 %242 }
 0x16b   :  { %v248_v30 = vsel %vm194_vm2, %v243_v29, 0 }
 0x16c   :  { %1653 = vmatpush3.bf16.xpose.msra.mxu0 %v248_v30 }
 0x16d   :  { %1664 = vmatprep.subr.bf16.mxu0 %v1949_v0 }
 0x16f   :  { %1649 = vmatmul.mubr.msk.bf16.vlgmr.msra.gmra.mxu1 %vm194_vm2, %v2083_v31 }
 0x170   :  { %1660 = vmatprep.mubr.msk.bf16.mxu1 %vm1950_vm0, %v1949_v0 }
 0x173   :  { %1655 = vmatmul.mubr.msk.bf16.vlgmr.msra.gmra.mxu0 %vm194_vm2, %v2090_v33 }
 0x174   :  { %1666 = vmatprep.mubr.msk.bf16.mxu0 %vm1950_vm0, %v1949_v0 }
 0x22f   :  { %v235_v36 = vpop.f32.mrf.mxu1 }
 0x230   :  { %v290_v38 = vsel %vm185_vm3, %v235_v36, -1000000.0 }
 0x231   :  { %v1650_v39 = vpop.f32.mrf.mxu1  ;;  %v292_v40 = vsel %vm194_vm2, %v290_v38, -inf }
 0x232   :  { %293 = vmax.xlane.f32.xlu0 %v292_v40 }
 0x233   :  { %v238_v41 = vpop.f32.mrf.mxu1  ;;  %v284_v42 = vpop.f32.mrf.mxu0 }
 0x234   :  { %v291_v43 = vsel %vm186_vm4, %v284_v42, -1000000.0 }
 0x235   :  { %v1651_v44 = vpop.f32.mrf.mxu1  ;;  %v1656_v45 = vpop.f32.mrf.mxu0  ;;  %v295_v46 = vsel %vm194_vm2, %v291_v43, -inf }
 0x236   :  { %296 = vmax.xlane.f32.xlu1 %v295_v46 }
 0x237   :  { %v287_v47 = vpop.f32.mrf.mxu0 }
 0x239   :  { %v1657_v48 = vpop.f32.mrf.mxu0 }
 0x247   :  { %316 = vrot.lane.b32.xlu1 %v2071_v7, %s1945_s24 }
 0x24b   :  { %418 = vrot.lane.b32.xlu1 %v2071_v7, %s1954_s1 }
 0x24f   :  { %469 = vrot.lane.b32.xlu1 %v2074_v15, %s1954_s1 }
 0x253   :  { %467 = vrot.lane.b32.xlu1 %v2090_v33, %s1955_s29 }
 0x2bb   :  { %v294_v49 = vpop.xlane.xlu0 %293 }
 0x2bc   :  { %v298_v50 = vsub.f32 %v290_v38, %v294_v49 }
 0x2be   :  { %v300_v51 = vmul.f32 1.442695, %v298_v50 }
 0x2bf   :  { %v297_v52 = vpop.xlane.xlu1 %296 }
 0x2c0   :  { %1818 = vpow2.f32 %v300_v51  ;;  %v299_v53 = vsub.f32 %v291_v43, %v297_v52 }
 0x2c2   :  { %v302_v54 = vmul.f32 1.442695, %v299_v53 }
 0x2c3   :  { %v317_v55 = vpop.permute.xlu1 %316 }
 0x2c4   :  { %1820 = vpow2.f32 %v302_v54  ;;  %v323_v56 = vsel %vm321_vm5, %v317_v55, 0 }
 0x2c5   :  { %1659 = vmatpush3.bf16.msra.mxu1 %v323_v56 }
 0x2c6   :  { %1670 = vmatprep.subr.bf16.mxu1 %v1949_v0 }
 0x2c7   :  { %v419_v5 = vpop.permute.xlu1 %418 }
 0x2c8   :  { %v424_v10 = vsel %vm194_vm2, %v419_v5, 0 }
 0x2cb   :  { %v470_v12 = vpop.permute.xlu1 %469 }
 0x2cc   :  { %v475_v14 = vsel %vm194_vm2, %v470_v12, 0  ;;  %v640_v12 = vld [vmem:[%s2342_s3 + $0x4] sm:$0xf] }
 0x2cd   :  { %v1819_v57 = vpop.eup %1818 }
 0x2ce   :  { %v304_v58 = vsel %vm194_vm2, %v1819_v57, 0.0 }
 0x2cf   :  { %305 = vadd.xlane.f32.xlu0 %v304_v58  ;;  %v468_v17 = vpop.permute.xlu1 %467 }
 0x2d1   :  { %v1821_v59 = vpop.eup %1820 }
 0x2d2   :  { %v307_v60 = vsel %vm194_vm2, %v1821_v59, 0.0 }
 0x2d3   :  { %308 = vadd.xlane.f32.xlu0 %v307_v60 }
 0x2e9   :  { %365 = vrot.lane.b32.xlu0 %v2074_v15, %s1945_s24  ;;  %s1956_s24 = smov 56  }
 0x2ed   :  { %416 = vrot.lane.b32.xlu0 %v2083_v31, %s1955_s29 }
 0x358   :  { %v306_v61 = vpop.xlane.xlu0 %305 }
 0x359   :  { %1822 = vrcp.f32 %v306_v61 }
 0x35c   :  { %v309_v62 = vpop.xlane.xlu0 %308 }
 0x35d   :  { %1824 = vrcp.f32 %v309_v62 }
 0x360   :  { %v366_v63 = vpop.permute.xlu0 %365 }
 0x361   :  { %v371_v1 = vsel %vm321_vm5, %v366_v63, 0 }
 0x362   :  { %1665 = vmatpush3.bf16.msra.mxu0 %v371_v1  ;;  %v414_v1 = vld [vmem:[%s2342_s3] sm:$0xf] }
 0x363   :  { %1676 = vmatprep.subr.bf16.mxu0 %v1949_v0 }
 0x364   :  { %v417_v16 = vpop.permute.xlu0 %416 }
 0x366   :  { %v1823_v2 = vpop.eup %1822 }
 0x367   :  { %v312_v6 = vmul.f32 %v1823_v2, %v1819_v57 }
 0x369   :  { %v314_v8 = vpack.c.bf16 %v312_v6, %v312_v6  ;;  %v692_v6 = vsel %vm321_vm5, %v414_v1, 0 }
 0x36a   :  { %v1825_v9 = vpop.eup %1824 }
 0x36b   :  { %1661 = vmatmul.mubr.msk.bf16.vlgmr.msra.gmra.mxu1 %vm194_vm2, %v314_v8  ;;  %v313_v11 = vmul.f32 %v1825_v9, %v1821_v59 }
 0x36c   :  { %1671 = vmatpush3.bf16.xpose.msra.mxu1 %v424_v10  ;;  %1672 = vmatprep.mubr.msk.bf16.mxu1 %vm1950_vm0, %v1949_v0 }
 0x36d   :  { %v315_v13 = vpack.c.bf16 %v313_v11, %v313_v11  ;;  %1682 = vmatprep.subr.bf16.mxu1 %v1949_v0 }
 0x36f   :  { %1667 = vmatmul.mubr.msk.bf16.vlgmr.msra.gmra.mxu0 %vm194_vm2, %v315_v13  ;;  %v645_v13 = vsel %vm321_vm5, %v640_v12, 0 }
 0x370   :  { %1677 = vmatpush3.bf16.xpose.msra.mxu0 %v475_v14  ;;  %1678 = vmatprep.mubr.msk.bf16.mxu0 %vm1950_vm0, %v1949_v0 }
 0x371   :  { %1688 = vmatprep.subr.bf16.mxu0 %v1949_v0 }
 0x373   :  { %1673 = vmatmul.mubr.msk.bf16.vlgmr.msra.gmra.mxu1 %vm194_vm2, %v417_v16 }
 0x374   :  { %1684 = vmatprep.mubr.msk.bf16.mxu1 %vm1950_vm0, %v1949_v0 }
 0x377   :  { %1679 = vmatmul.mubr.msk.bf16.vlgmr.msra.gmra.mxu0 %vm194_vm2, %v468_v17 }
 0x378   :  { %1690 = vmatprep.mubr.msk.bf16.mxu0 %vm1950_vm0, %v1949_v0 }
 0x42b   :  { %v2144_v18 = vpop.f32.mrf.mxu1 }
 0x42d   :  { %v1662_v19 = vpop.f32.mrf.mxu1 }
 0x42f   :  { %v362_v20 = vpop.f32.mrf.mxu1  ;;  %v2146_v21 = vpop.f32.mrf.mxu0 }
 0x430   :  { %v413_v22 = vpack.c.bf16 %v2146_v21, %v2144_v18 }
 0x431   :  { %v1663_v23 = vpop.f32.mrf.mxu1  ;;  %v1668_v24 = vpop.f32.mrf.mxu0 }
 0x433   :  { %v410_v25 = vpop.f32.mrf.mxu0  ;;  %v460_v26 = vpop.f32.mrf.mxu1 }
 0x434   :  { %v517_v27 = vsel %vm185_vm3, %v460_v26, -1000000.0 }
 0x435   :  { %v1669_v28 = vpop.f32.mrf.mxu0  ;;  %v1674_v29 = vpop.f32.mrf.mxu1  ;;  %v519_v30 = vsel %vm194_vm2, %v517_v27, -inf }
 0x436   :  { %520 = vmax.xlane.f32.xlu0 %v519_v30 }
 0x437   :  { %v463_v32 = vpop.f32.mrf.mxu1  ;;  %v511_v36 = vpop.f32.mrf.mxu0 }
 0x438   :  { %v518_v38 = vsel %vm186_vm4, %v511_v36, -1000000.0 }
 0x439   :  { %v1675_v39 = vpop.f32.mrf.mxu1  ;;  %v1680_v40 = vpop.f32.mrf.mxu0  ;;  %v522_v41 = vsel %vm194_vm2, %v518_v38, -inf }
 0x43a   :  { %523 = vmax.xlane.f32.xlu1 %v522_v41 }
 0x43b   :  { %v514_v42 = vpop.f32.mrf.mxu0 }
 0x43d   :  { %v1681_v43 = vpop.f32.mrf.mxu0 }
 0x44b   :  { %543 = vrot.lane.b32.xlu1 %v2071_v7, %s1956_s24 }
 0x44f   :  { %737 = vrot.lane.b32.xlu1 %v2071_v7, %s1957_s30 }
 0x453   :  { %787 = vrot.lane.b32.xlu1 %v2074_v15, %s1957_s30 }
 0x457   :  { %785 = vrot.lane.b32.xlu1 %v2090_v33, %s1958_s13 }
 0x4bf   :  { %v521_v44 = vpop.xlane.xlu0 %520 }
 0x4c0   :  { %v525_v45 = vsub.f32 %v517_v27, %v521_v44 }
 0x4c2   :  { %v527_v46 = vmul.f32 1.442695, %v525_v45 }
 0x4c3   :  { %v524_v47 = vpop.xlane.xlu1 %523 }
 0x4c4   :  { %1826 = vpow2.f32 %v527_v46  ;;  %v526_v48 = vsub.f32 %v518_v38, %v524_v47 }
 0x4c6   :  { %v529_v49 = vmul.f32 1.442695, %v526_v48 }
 0x4c7   :  { %v544_v50 = vpop.permute.xlu1 %543 }
 0x4c8   :  { %1828 = vpow2.f32 %v529_v49  ;;  %v549_v51 = vsel %vm321_vm5, %v544_v50, 0 }
 0x4c9   :  { %1683 = vmatpush3.bf16.msra.mxu1 %v549_v51 }
 0x4ca   :  { %1694 = vmatprep.subr.bf16.mxu1 %v1949_v0 }
 0x4cb   :  { %v738_v8 = vpop.permute.xlu1 %737 }
 0x4cf   :  { %v788_v9 = vpop.permute.xlu1 %787 }
 0x4d0   :  { %v793_v10 = vsel %vm194_vm2, %v788_v9, 0 }
 0x4d1   :  { %v1827_v52 = vpop.eup %1826 }
 0x4d2   :  { %v531_v53 = vsel %vm194_vm2, %v1827_v52, 0.0 }
 0x4d3   :  { %532 = vadd.xlane.f32.xlu0 %v531_v53  ;;  %v786_v11 = vpop.permute.xlu1 %785 }
 0x4d5   :  { %v1829_v54 = vpop.eup %1828 }
 0x4d6   :  { %v534_v55 = vsel %vm194_vm2, %v1829_v54, 0.0 }
 0x4d7   :  { %535 = vadd.xlane.f32.xlu0 %v534_v55 }
 0x4ed   :  { %591 = vrot.lane.b32.xlu0 %v2074_v15, %s1956_s24 }
 0x4f1   :  { %735 = vrot.lane.b32.xlu0 %v2083_v31, %s1958_s13 }
 0x55c   :  { %v533_v56 = vpop.xlane.xlu0 %532 }
 0x55d   :  { %1830 = vrcp.f32 %v533_v56 }
 0x560   :  { %v536_v57 = vpop.xlane.xlu0 %535 }
 0x561   :  { %1832 = vrcp.f32 %v536_v57 }
 0x564   :  { %v592_v58 = vpop.permute.xlu0 %591 }
 0x565   :  { %v597_v59 = vsel %vm321_vm5, %v592_v58, 0 }
 0x566   :  { %1689 = vmatpush3.bf16.msra.mxu0 %v597_v59 }
 0x567   :  { %1700 = vmatprep.subr.bf16.mxu0 %v1949_v0 }
 0x568   :  { %v736_v26 = vpop.permute.xlu0 %735 }
 0x56a   :  { %v1831_v60 = vpop.eup %1830 }
 0x56b   :  { %v539_v61 = vmul.f32 %v1831_v60, %v1827_v52 }
 0x56d   :  { %v541_v62 = vpack.c.bf16 %v539_v61, %v539_v61 }
 0x56e   :  { %v1833_v63 = vpop.eup %1832 }
 0x56f   :  { %1685 = vmatmul.mubr.msk.bf16.vlgmr.msra.gmra.mxu1 %vm194_vm2, %v541_v62  ;;  %v540_v2 = vmul.f32 %v1833_v63, %v1829_v54 }
 0x570   :  { %1696 = vmatprep.mubr.msk.bf16.mxu1 %vm1950_vm0, %v1949_v0  ;;  %1695 = vmatpush3.bf16.msra.mxu1 %v645_v13 }
 0x571   :  { %v542_v5 = vpack.c.bf16 %v540_v2, %v540_v2  ;;  %1706 = vmatprep.subr.bf16.mxu1 %v1949_v0 }
 0x573   :  { %1691 = vmatmul.mubr.msk.bf16.vlgmr.msra.gmra.mxu0 %vm194_vm2, %v542_v5 }
 0x574   :  { %1701 = vmatpush3.bf16.msra.mxu0 %v692_v6  ;;  %1702 = vmatprep.mubr.msk.bf16.mxu0 %vm1950_vm0, %v1949_v0 }
 0x575   :  { %1712 = vmatprep.subr.bf16.mxu0 %v1949_v0 }
 0x57b   :  { %1703 = vmatmul.mubr.msk.bf16.vlgmr.msra.gmra.mxu0 %vm194_vm2, %v413_v22  ;;  %v743_v22 = vsel %vm194_vm2, %v738_v8, 0 }
 0x57c   :  { %1713 = vmatpush3.bf16.xpose.msra.mxu0 %v793_v10  ;;  %1714 = vmatprep.mubr.msk.bf16.mxu0 %vm1950_vm0, %v1949_v0 }
 0x57d   :  { %1724 = vmatprep.subr.bf16.mxu0 %v1949_v0 }
 0x583   :  { %1715 = vmatmul.mubr.msk.bf16.vlgmr.msra.gmra.mxu0 %vm194_vm2, %v786_v11 }
 0x584   :  { %1726 = vmatprep.mubr.msk.bf16.mxu0 %vm1950_vm0, %v1949_v0 }
 0x62f   :  { %v585_v14 = vpop.f32.mrf.mxu1 }
 0x631   :  { %v1686_v16 = vpop.f32.mrf.mxu1 }
 0x633   :  { %v588_v17 = vpop.f32.mrf.mxu1  ;;  %v633_v18 = vpop.f32.mrf.mxu0 }
 0x634   :  { %v639_v19 = vpack.c.bf16 %v633_v18, %v585_v14  ;;  %v958_v14 = vld [vmem:[%s2342_s3 + $0x8] sm:$0xf] }
 0x635   :  { %v1687_v20 = vpop.f32.mrf.mxu1  ;;  %v1692_v21 = vpop.f32.mrf.mxu0  ;;  %v963_v16 = vsel %vm321_vm5, %v958_v14, 0 }
 0x636   :  { %1697 = vmatmul.mubr.msk.bf16.vlgmr.msra.gmra.mxu1 %vm194_vm2, %v639_v19 }
 0x637   :  { %1707 = vmatpush3.bf16.xpose.msra.mxu1 %v743_v22  ;;  %v636_v23 = vpop.f32.mrf.mxu0  ;;  %1708 = vmatprep.mubr.msk.bf16.mxu1 %vm1950_vm0, %v1949_v0 }
 0x638   :  { %1718 = vmatprep.subr.bf16.mxu1 %v1949_v0 }
 0x639   :  { %v1693_v24 = vpop.f32.mrf.mxu0 }
 0x63b   :  { %v2202_v25 = vpop.f32.mrf.mxu0 }
 0x63d   :  { %v1704_v27 = vpop.f32.mrf.mxu0 }
 0x63e   :  { %1709 = vmatmul.mubr.msk.bf16.vlgmr.msra.gmra.mxu1 %vm194_vm2, %v736_v26 }
 0x63f   :  { %v2205_v28 = vpop.f32.mrf.mxu0  ;;  %1720 = vmatprep.mubr.msk.bf16.mxu1 %vm1950_vm0, %v1949_v0 }
 0x641   :  { %v1705_v29 = vpop.f32.mrf.mxu0 }
 0x643   :  { %v829_v30 = vpop.f32.mrf.mxu0 }
 0x644   :  { %v836_v32 = vsel %vm186_vm4, %v829_v30, -1000000.0 }
 0x645   :  { %v1716_v36 = vpop.f32.mrf.mxu0  ;;  %v840_v38 = vsel %vm194_vm2, %v836_v32, -inf }
 0x646   :  { %841 = vmax.xlane.f32.xlu1 %v840_v38 }
 0x647   :  { %v832_v39 = vpop.f32.mrf.mxu0 }
 0x649   :  { %v1717_v40 = vpop.f32.mrf.mxu0 }
 0x657   :  { %861 = vrot.lane.b32.xlu1 %v2071_v7, %s1959_s18 }
 0x65b   :  { %1010 = vrot.lane.b32.xlu1 %v2071_v7, %s1960_s6 }
 0x65f   :  { %1060 = vrot.lane.b32.xlu1 %v2074_v15, %s1960_s6 }
 0x663   :  { %1058 = vrot.lane.b32.xlu1 %v2090_v33, %s1961_s19 }
 0x6cf   :  { %v842_v41 = vpop.xlane.xlu1 %841 }
 0x6d0   :  { %v844_v44 = vsub.f32 %v836_v32, %v842_v41 }
 0x6d2   :  { %v847_v45 = vmul.f32 1.442695, %v844_v44 }
 0x6d3   :  { %v862_v42 = vpop.permute.xlu1 %861 }
 0x6d4   :  { %v867_v43 = vsel %vm321_vm5, %v862_v42, 0  ;;  %1834 = vpow2.f32 %v847_v45 }
 0x6d5   :  { %1719 = vmatpush3.bf16.msra.mxu1 %v867_v43 }
 0x6d6   :  { %1730 = vmatprep.subr.bf16.mxu1 %v1949_v0 }
 0x6d7   :  { %v1011_v8 = vpop.permute.xlu1 %1010 }
 0x6d8   :  { %v1016_v10 = vsel %vm194_vm2, %v1011_v8, 0 }
 0x6db   :  { %v1061_v22 = vpop.permute.xlu1 %1060 }
 0x6dc   :  { %v1066_v36 = vsel %vm194_vm2, %v1061_v22, 0 }
 0x6df   :  { %v1059_v40 = vpop.permute.xlu1 %1058 }
 0x6e1   :  { %v1835_v53 = vpop.eup %1834 }
 0x6e2   :  { %v852_v56 = vsel %vm194_vm2, %v1835_v53, 0.0 }
 0x6f6   :  { %v2221_v46 = vpop.f32.mrf.mxu1 }
 0x6f8   :  { %v1698_v47 = vpop.f32.mrf.mxu1 }
 0x6f9   :  { %v729_v47 = vadd.f32 %v2202_v25, %v2221_v46 }
 0x6fa   :  { %v2223_v48 = vpop.f32.mrf.mxu1 }
 0x6fc   :  { %v1699_v49 = vpop.f32.mrf.mxu1 }
 0x6fe   :  { %v779_v50 = vpop.f32.mrf.mxu1 }
 0x6ff   :  { %v835_v33 = vsel %vm185_vm3, %v779_v50, -1000000.0 }
 0x700   :  { %v1710_v51 = vpop.f32.mrf.mxu1  ;;  %v837_v52 = vsel %vm194_vm2, %v835_v33, -inf }
 0x701   :  { %838 = vmax.xlane.f32.xlu0 %v837_v52  ;;  %v732_v51 = vadd.f32 %v2205_v28, %v2223_v48 }
 0x702   :  { %v782_v54 = vpop.f32.mrf.mxu1 }
 0x704   :  { %v1711_v55 = vpop.f32.mrf.mxu1 }
 0x705   :  { %853 = vadd.xlane.f32.xlu0 %v852_v56 }
 0x78a   :  { %v839_v57 = vpop.xlane.xlu0 %838 }
 0x78b   :  { %v843_v58 = vsub.f32 %v835_v33, %v839_v57 }
 0x78d   :  { %v845_v59 = vmul.f32 1.442695, %v843_v58 }
 0x78e   :  { %v854_v62 = vpop.xlane.xlu0 %853 }
 0x78f   :  { %1836 = vpow2.f32 %v845_v59 }
 0x790   :  { %1838 = vrcp.f32 %v854_v62 }
 0x79c   :  { %v1837_v60 = vpop.eup %1836 }
 0x79d   :  { %v849_v61 = vsel %vm194_vm2, %v1837_v60, 0.0  ;;  %v1839_v63 = vpop.eup %1838 }
 0x79e   :  { %850 = vadd.xlane.f32.xlu0 %v849_v61  ;;  %v858_v2 = vmul.f32 %v1839_v63, %v1835_v53 }
 0x7a0   :  { %v860_v9 = vpack.c.bf16 %v858_v2, %v858_v2  ;;  %v1231_v2 = vld [vmem:[%s2342_s3 + $0xc] sm:$0xf] }
 0x7b4   :  { %909 = vrot.lane.b32.xlu0 %v2074_v15, %s1959_s18 }
 0x7b8   :  { %1008 = vrot.lane.b32.xlu0 %v2083_v31, %s1961_s19 }
 0x827   :  { %v851_v1 = vpop.xlane.xlu0 %850 }
 0x828   :  { %1840 = vrcp.f32 %v851_v1 }
 0x82b   :  { %v910_v5 = vpop.permute.xlu0 %909 }
 0x82c   :  { %v915_v6 = vsel %vm321_vm5, %v910_v5, 0  ;;  %v1236_v5 = vsel %vm321_vm5, %v1231_v2, 0 }
 0x82d   :  { %1725 = vmatpush3.bf16.msra.mxu0 %v915_v6 }
 0x82e   :  { %1736 = vmatprep.subr.bf16.mxu0 %v1949_v0 }
 0x82f   :  { %v1009_v12 = vpop.permute.xlu0 %1008 }
 0x830   :  { %1727 = vmatmul.mubr.msk.bf16.vlgmr.msra.gmra.mxu0 %vm194_vm2, %v860_v9 }
 0x831   :  { %1737 = vmatpush3.bf16.xpose.msra.mxu0 %v1016_v10  ;;  %1738 = vmatprep.mubr.msk.bf16.mxu0 %vm1950_vm0, %v1949_v0 }
 0x832   :  { %1748 = vmatprep.subr.bf16.mxu0 %v1949_v0 }
 0x835   :  { %v1841_v31 = vpop.eup %1840 }
 0x836   :  { %v857_v11 = vmul.f32 %v1841_v31, %v1837_v60 }
 0x838   :  { %1739 = vmatmul.mubr.msk.bf16.vlgmr.msra.gmra.mxu0 %vm194_vm2, %v1009_v12  ;;  %v859_v13 = vpack.c.bf16 %v857_v11, %v857_v11 }
 0x839   :  { %1750 = vmatprep.mubr.msk.bf16.mxu0 %vm1950_vm0, %v1949_v0 }
 0x83a   :  { %1721 = vmatmul.mubr.msk.bf16.vlgmr.msra.gmra.mxu1 %vm194_vm2, %v859_v13 }
 0x83b   :  { %1732 = vmatprep.mubr.msk.bf16.mxu1 %vm1950_vm0, %v1949_v0  ;;  %1731 = vmatpush3.bf16.msra.mxu1 %v963_v16 }
 0x83c   :  { %1742 = vmatprep.subr.bf16.mxu1 %v1949_v0 }
 0x8f0   :  { %v951_v17 = vpop.f32.mrf.mxu0 }
 0x8f2   :  { %v1728_v18 = vpop.f32.mrf.mxu0 }
 0x8f4   :  { %v954_v19 = vpop.f32.mrf.mxu0 }
 0x8f6   :  { %v1729_v20 = vpop.f32.mrf.mxu0 }
 0x8f8   :  { %v1052_v21 = vpop.f32.mrf.mxu0 }
 0x8f9   :  { %v1108_v23 = vsel %vm185_vm3, %v1052_v21, -1000000.0 }
 0x8fa   :  { %v903_v24 = vpop.f32.mrf.mxu1  ;;  %v1740_v26 = vpop.f32.mrf.mxu0  ;;  %v1110_v27 = vsel %vm194_vm2, %v1108_v23, -inf }
 0x8fb   :  { %v957_v29 = vpack.c.bf16 %v951_v17, %v903_v24  ;;  %1111 = vmax.xlane.f32.xlu0 %v1110_v27 }
 0x8fc   :  { %v1722_v30 = vpop.f32.mrf.mxu1  ;;  %v1055_v32 = vpop.f32.mrf.mxu0 }
 0x8fd   :  { %1733 = vmatmul.mubr.msk.bf16.vlgmr.msra.gmra.mxu1 %vm194_vm2, %v957_v29 }
 0x8fe   :  { %1743 = vmatpush3.bf16.xpose.msra.mxu1 %v1066_v36  ;;  %v906_v38 = vpop.f32.mrf.mxu1  ;;  %v1741_v39 = vpop.f32.mrf.mxu0  ;;  %1744 = vmatprep.mubr.msk.bf16.mxu1 %vm1950_vm0, %v1949_v0 }
 0x8ff   :  { %1754 = vmatprep.subr.bf16.mxu1 %v1949_v0 }
 0x900   :  { %v1723_v35 = vpop.f32.mrf.mxu1 }
 0x905   :  { %1745 = vmatmul.mubr.msk.bf16.vlgmr.msra.gmra.mxu1 %vm194_vm2, %v1059_v40 }
 0x906   :  { %1756 = vmatprep.mubr.msk.bf16.mxu1 %vm1950_vm0, %v1949_v0 }
 0x984   :  { %v1112_v41 = vpop.xlane.xlu0 %1111 }
 0x985   :  { %v1116_v42 = vsub.f32 %v1108_v23, %v1112_v41 }
 0x987   :  { %v1118_v43 = vmul.f32 1.442695, %v1116_v42 }
 0x989   :  { %1842 = vpow2.f32 %v1118_v43 }
 0x996   :  { %v1843_v44 = vpop.eup %1842 }
 0x997   :  { %v1122_v45 = vsel %vm194_vm2, %v1843_v44, 0.0 }
 0x998   :  { %1123 = vadd.xlane.f32.xlu0 %v1122_v45 }
 0x9bd   :  { %v999_v49 = vpop.f32.mrf.mxu1 }
 0x9be   :  { %v1006_v50 = vadd.f32 %v999_v49, %v729_v47  ;;  %v1812_v47 = vld [vmem:[#allocation5 + $0x8] sm:$0xff]   ;;  %v1814_v49 = vld [vmem:[%s2347_s8 + $0x18] sm:$0xff]  }
 0x9bf   :  { %v1734_v33 = vpop.f32.mrf.mxu1 }
 0x9c1   :  { %v1002_v52 = vpop.f32.mrf.mxu1 }
 0x9c2   :  { %v1007_v53 = vadd.f32 %v1002_v52, %v732_v51 }
 0x9c3   :  { %v1735_v54 = vpop.f32.mrf.mxu1 }
 0x9c5   :  { %v1102_v55 = vpop.f32.mrf.mxu1 }
 0x9c6   :  { %v1109_v56 = vsel %vm186_vm4, %v1102_v55, -1000000.0 }
 0x9c7   :  { %v1746_v57 = vpop.f32.mrf.mxu1  ;;  %v1113_v58 = vsel %vm194_vm2, %v1109_v56, -inf }
 0x9c8   :  { %1114 = vmax.xlane.f32.xlu1 %v1113_v58  ;;  %v1573_v57 = vld [vmem:[%s2343_s4] ss:$0 sm:$0xff] }
 0x9c9   :  { %v1105_v59 = vpop.f32.mrf.mxu1 }
 0x9cb   :  { %v1747_v25 = vpop.f32.mrf.mxu1 }
 0x9d9   :  { %1134 = vrot.lane.b32.xlu1 %v2071_v7, %s1962_s21 }
 0xa21   :  { %v1124_v46 = vpop.xlane.xlu0 %1123 }
 0xa22   :  { %1844 = vrcp.f32 %v1124_v46  ;;  %v1574_v46 = vld [vmem:[#allocation2] ss:$0 sm:$0xff] }
 0xa2f   :  { %v1845_v28 = vpop.eup %1844 }
 0xa30   :  { %v1130_v62 = vmul.f32 %v1845_v28, %v1843_v44 }
 0xa32   :  { %v1132_v37 = vpack.c.bf16 %v1130_v62, %v1130_v62  ;;  %v1815_v62 = vld [vmem:[%s2347_s8 + $0x10] sm:$0xff]  }
 0xa51   :  { %v1115_v48 = vpop.xlane.xlu1 %1114 }
 0xa52   :  { %v1117_v60 = vsub.f32 %v1109_v56, %v1115_v48 }
 0xa54   :  { %v1120_v61 = vmul.f32 1.442695, %v1117_v60 }
 0xa55   :  { %v1135_v63 = vpop.permute.xlu1 %1134 }
 0xa56   :  { %1846 = vpow2.f32 %v1120_v61  ;;  %v1140_v34 = vsel %vm321_vm5, %v1135_v63, 0  ;;  %v1816_v63 = vld [vmem:[%s2347_s8 + $0x8] sm:$0xff]  }
 0xa57   :  { %1749 = vmatpush3.bf16.msra.mxu0 %v1140_v34  ;;  %v1817_v34 = vld [vmem:[%s2347_s8] sm:$0xff]  }
 0xa58   :  { %1760 = vmatprep.subr.bf16.mxu0 %v1949_v0 }
 0xa5a   :  { %1751 = vmatmul.mubr.msk.bf16.vlgmr.msra.gmra.mxu0 %vm194_vm2, %v1132_v37  ;;  %v1575_v37 = vld [vmem:[#allocation7] ss:$0 sm:$0xff] }
 0xa5b   :  { %1762 = vmatprep.mubr.msk.bf16.mxu0 %vm1950_vm0, %v1949_v0  ;;  %1761 = vmatpush3.bf16.msra.mxu0 %v1236_v5 }
 0xa5c   :  { %1774 = vmatprep.subr.bf16.mxu0 %v1949_v0 }
 0xa63   :  { %v1847_v7 = vpop.eup %1846 }
 0xa64   :  { %v1125_v1 = vsel %vm194_vm2, %v1847_v7, 0.0 }
 0xa65   :  { %1126 = vadd.xlane.f32.xlu0 %v1125_v1 }
 0xa7b   :  { %1182 = vrot.lane.b32.xlu0 %v2074_v15, %s1962_s21 }
 0xaee   :  { %v1127_v6 = vpop.xlane.xlu0 %1126 }
 0xaef   :  { %1848 = vrcp.f32 %v1127_v6 }
 0xaf2   :  { %v1183_v8 = vpop.permute.xlu0 %1182 }
 0xaf3   :  { %v1188_v9 = vsel %vm321_vm5, %v1183_v8, 0 }
 0xaf4   :  { %1755 = vmatpush3.bf16.msra.mxu1 %v1188_v9 }
 0xaf5   :  { %1766 = vmatprep.subr.bf16.mxu1 %v1949_v0 }
 0xafc   :  { %v1849_v10 = vpop.eup %1848 }
 0xafd   :  { %v1131_v31 = vmul.f32 %v1849_v10, %v1847_v7 }
 0xaff   :  { %v1133_v15 = vpack.c.bf16 %v1131_v31, %v1131_v31 }
 0xb01   :  { %1757 = vmatmul.mubr.msk.bf16.vlgmr.msra.gmra.mxu1 %vm194_vm2, %v1133_v15 }
 0xb02   :  { %1770 = vmatprep.mubr.msk.bf16.mxu1 %vm1950_vm0, %v1949_v0  ;;  %1767 = vmatpush3.bf16.msra.mxu1 %v1812_v47 }
 0xb03   :  { %1768 = vmatprep.subr.bf16.mxu1 %v1949_v0 }
 0xb1a   :  { %v1176_v11 = vpop.f32.mrf.mxu0 }
 0xb1c   :  { %v1752_v12 = vpop.f32.mrf.mxu0 }
 0xb1e   :  { %v1179_v13 = vpop.f32.mrf.mxu0 }
 0xb20   :  { %v1753_v14 = vpop.f32.mrf.mxu0 }
 0xbc1   :  { %v1224_v16 = vpop.f32.mrf.mxu1 }
 0xbc2   :  { %v1230_v17 = vpack.c.bf16 %v1224_v16, %v1176_v11 }
 0xbc3   :  { %v1758_v18 = vpop.f32.mrf.mxu1 }
 0xbc4   :  { %1763 = vmatmul.mubr.msk.bf16.vlgmr.msra.gmra.mxu0 %vm194_vm2, %v1230_v17 }
 0xbc5   :  { %v1227_v19 = vpop.f32.mrf.mxu1  ;;  %1782 = vmatprep.mubr.msk.bf16.mxu0 %vm1950_vm0, %v1949_v0  ;;  %1775 = vmatpush3.bf16.msra.mxu0 %v1814_v49 }
 0xbc6   :  { %1776 = vmatprep.subr.bf16.mxu0 %v1949_v0 }
 0xbc7   :  { %v1759_v20 = vpop.f32.mrf.mxu1 }
 0xbc9   :  { %1777 = vmatpush3.bf16.msra.mxu0 %v1815_v62 }
 0xbca   :  { %1778 = vmatprep.subr.bf16.mxu0 %v1949_v0 }
 0xbcd   :  { %1779 = vmatpush3.bf16.msra.mxu0 %v1816_v63 }
 0xbce   :  { %1780 = vmatprep.subr.bf16.mxu0 %v1949_v0  ;;  %v1579_v0 = vld [vmem:[%s2348_s9] ss:$0 sm:$0xff] }
 0xbd1   :  { %1781 = vmatpush3.bf16.msra.mxu0 %v1817_v34 }
 0xc84   :  { %v1272_v21 = vpop.f32.mrf.mxu0 }
 0xc85   :  { %v1279_v22 = vadd.f32 %v1272_v21, %v1006_v50 }
 0xc86   :  { %v1764_v23 = vpop.f32.mrf.mxu0 }
 0xc87   :  { %v1281_v24 = vadd.f32 %v1279_v22, %v2057_v3 }
 0xc88   :  { %v1275_v26 = vpop.f32.mrf.mxu0 }
 0xc89   :  { %v1280_v27 = vadd.f32 %v1275_v26, %v1007_v53  ;;  %v1285_v29 = vsel %vm99_vm1, %v1281_v24, 0.0 }
 0xc8a   :  { %1286 = vadd.xlane.f32.xlu1 %v1285_v29  ;;  %v1765_v30 = vpop.f32.mrf.mxu0 }
 0xc8b   :  { %v1282_v32 = vadd.f32 %v1280_v27, %v2062_v4  ;;  %v1813_v4 = vld [vmem:[#allocation5] sm:$0xff]  }
 0xc8c   :  { %1769 = vmatpush3.bf16.msra.mxu1 %v1813_v4 }
 0xc8d   :  { %v1288_v36 = vsel %vm99_vm1, %v1282_v32, 0.0 }
 0xc8e   :  { %1289 = vadd.xlane.f32.xlu0 %v1288_v36 }
 0xd13   :  { %v1287_v38 = vpop.xlane.xlu1 %1286 }
 0xd14   :  { %v1292_v39 = vmul.f32 0.03125, %v1287_v38 }
 0xd16   :  { %v1294_v35 = vsub.f32 %v1281_v24, %v1292_v39 }
 0xd17   :  { %v1290_v40 = vpop.xlane.xlu0 %1289 }
 0xd18   :  { %v1293_v41 = vmul.f32 0.03125, %v1290_v40  ;;  %v1296_v42 = vmul.f32 %v1294_v35, %v1294_v35 }
 0xd1a   :  { %v1295_v43 = vsub.f32 %v1282_v32, %v1293_v41  ;;  %v1298_v3 = vsel %vm99_vm1, %v1296_v42, 0.0 }
 0xd1b   :  { %1299 = vadd.xlane.f32.xlu1 %v1298_v3  ;;  %v1585_v3 = vld [vmem:[%s2349_s10] ss:$0 sm:$0xff] }
 0xd1c   :  { %v1297_v44 = vmul.f32 %v1295_v43, %v1295_v43 }
 0xd1e   :  { %v1301_v45 = vsel %vm99_vm1, %v1297_v44, 0.0 }
 0xd1f   :  { %1302 = vadd.xlane.f32.xlu0 %v1301_v45  ;;  %v1586_v45 = vld [vmem:[%s2350_s11] ss:$0 sm:$0xff] }
 0xda4   :  { %v1300_v50 = vpop.xlane.xlu1 %1299 }
 0xda5   :  { %v1304_v33 = vmul.f32 0.03125, %v1300_v50 }
 0xda7   :  { %v1306_v51 = vadd.f32 1e-05, %v1304_v33 }
 0xda8   :  { %v1303_v52 = vpop.xlane.xlu0 %1302 }
 0xda9   :  { %1850 = vrsqrt.f32 %v1306_v51  ;;  %v1305_v53 = vmul.f32 0.03125, %v1303_v52 }
 0xdab   :  { %v1307_v54 = vadd.f32 1e-05, %v1305_v53 }
 0xdad   :  { %1852 = vrsqrt.f32 %v1307_v54 }
 0xdb6   :  { %v1851_v55 = vpop.eup %1850 }
 0xdb7   :  { %v1310_v56 = vmul.f32 %v1851_v55, %v1294_v35 }
 0xdb9   :  { %v1318_v25 = vmul.f32 %v1573_v57, %v1310_v56 }
 0xdba   :  { %v1853_v58 = vpop.eup %1852 }
 0xdbb   :  { %v1311_v59 = vmul.f32 %v1853_v58, %v1295_v43  ;;  %v1326_v48 = vadd.f32 %v1574_v46, %v1318_v25 }
 0xdbd   :  { %v1319_v28 = vmul.f32 %v1573_v57, %v1311_v59 }
 0xdbf   :  { %v1327_v60 = vadd.f32 %v1574_v46, %v1319_v28 }
 0xdc1   :  { %v1328_v61 = vpack.c.bf16 %v1327_v60, %v1326_v48 }
 0xdc3   :  { %1771 = vmatmul.mubr.msk.bf16.vlgmr.msra.gmra.mxu1 %vm99_vm1, %v1328_v61 }
 0xe83   :  { %v1389_v7 = vpop.f32.mrf.mxu1 }
 0xe84   :  { %v1390_v2 = vadd.f32 %v1575_v37, %v1389_v7 }
 0xe85   :  { %v1772_v1 = vpop.f32.mrf.mxu1 }
 0xe86   :  { %v1396_v9 = vmax.f32 %v1390_v2, 0.0 }
 0xe87   :  { %v1392_v5 = vpop.f32.mrf.mxu1 }
 0xe88   :  { %v1393_v6 = vadd.f32 %v1575_v37, %v1392_v5 }
 0xe89   :  { %v1773_v8 = vpop.f32.mrf.mxu1 }
 0xe8a   :  { %v1397_v10 = vmax.f32 %v1393_v6, 0.0 }
 0xe8c   :  { %v1398_v31 = vpack.c.bf16 %v1397_v10, %v1396_v9 }
 0xe8e   :  { %1783 = vmatmul.mubr.msk.bf16.vlgmr.msra.gmra.mxu0 %vm1438_vm6, %v1398_v31 }
 0xf4e   :  { %v1476_v15 = vpop.f32.mrf.mxu0 }
 0xf4f   :  { %v1477_v11 = vadd.f32 %v1579_v0, %v1476_v15 }
 0xf50   :  { %v1784_v12 = vpop.f32.mrf.mxu0 }
 0xf51   :  { %v1483_v13 = vadd.f32 %v1477_v11, %v1326_v48 }
 0xf52   :  { %v1479_v14 = vpop.f32.mrf.mxu0 }
 0xf53   :  { %v1480_v16 = vadd.f32 %v1579_v0, %v1479_v14  ;;  %v1487_v17 = vsel %vm99_vm1, %v1483_v13, 0.0 }
 0xf54   :  { %1488 = vadd.xlane.f32.xlu1 %v1487_v17  ;;  %v1785_v18 = vpop.f32.mrf.mxu0 }
 0xf55   :  { %v1484_v19 = vadd.f32 %v1480_v16, %v1327_v60 }
 0xf57   :  { %v1490_v20 = vsel %vm99_vm1, %v1484_v19, 0.0 }
 0xf58   :  { %1491 = vadd.xlane.f32.xlu0 %v1490_v20 }
 0xfdd   :  { %v1489_v21 = vpop.xlane.xlu1 %1488 }
 0xfde   :  { %v1493_v22 = vmul.f32 0.03125, %v1489_v21 }
 0xfe0   :  { %v1495_v23 = vsub.f32 %v1483_v13, %v1493_v22 }
 0xfe1   :  { %v1492_v24 = vpop.xlane.xlu0 %1491 }
 0xfe2   :  { %v1494_v26 = vmul.f32 0.03125, %v1492_v24  ;;  %v1497_v27 = vmul.f32 %v1495_v23, %v1495_v23 }
 0xfe4   :  { %v1496_v29 = vsub.f32 %v1484_v19, %v1494_v26  ;;  %v1499_v30 = vsel %vm99_vm1, %v1497_v27, 0.0 }
 0xfe5   :  { %1500 = vadd.xlane.f32.xlu1 %v1499_v30 }
 0xfe6   :  { %v1498_v32 = vmul.f32 %v1496_v29, %v1496_v29 }
 0xfe8   :  { %v1502_v36 = vsel %vm99_vm1, %v1498_v32, 0.0 }
 0xfe9   :  { %1503 = vadd.xlane.f32.xlu0 %v1502_v36 }
0x106e   :  { %v1501_v38 = vpop.xlane.xlu1 %1500 }
0x106f   :  { %v1505_v39 = vmul.f32 0.03125, %v1501_v38 }
0x1071   :  { %v1507_v35 = vadd.f32 1e-05, %v1505_v39 }
0x1072   :  { %v1504_v40 = vpop.xlane.xlu0 %1503 }
0x1073   :  { %1854 = vrsqrt.f32 %v1507_v35  ;;  %v1506_v41 = vmul.f32 0.03125, %v1504_v40 }
0x1075   :  { %v1508_v42 = vadd.f32 1e-05, %v1506_v41 }
0x1077   :  { %1856 = vrsqrt.f32 %v1508_v42 }
0x1080   :  { %v1855_v43 = vpop.eup %1854 }
0x1081   :  { %v1511_v44 = vmul.f32 %v1855_v43, %v1495_v23 }
0x1083   :  { %v1519_v47 = vmul.f32 %v1585_v3, %v1511_v44 }
0x1084   :  { %v1857_v4 = vpop.eup %1856 }
0x1085   :  { %v1512_v49 = vmul.f32 %v1857_v4, %v1496_v29  ;;  %v1527_v50 = vadd.f32 %v1586_v45, %v1519_v47 }
0x1087   :  { %v1520_v33 = vmul.f32 %v1585_v3, %v1512_v49  ;;  %1529 = vst.msk [vmem:[#allocation8] sm:$0xff] %vm99_vm1, %v1527_v50 }
0x1089   :  { %v1528_v51 = vadd.f32 %v1586_v45, %v1520_v33 }
0x108b   :  { %1530 = vst.msk [vmem:[#allocation8 + $0x8] sm:$0xff] %vm99_vm1, %v1528_v51 }
0x108c   :  { %1929 = shalt.err (!%p1926_p5)
}
0x108d   :  { %s1964_s10 = smov 128   ;;  %s1965_s11 = smov 8  }
0x108e   :  { %1542 = dma.vmem_to_hbm [thread:$0]  %s1537_s15, 256, %s2351_s12, [#allocation4], %s1964_s10, %s1964_s10, %s1965_s11  }
0x108f   :  { %1942 = dma.done.wait [#allocation4], 256  }
0x1090   :  { %1943 = vsyncadd [#allocation4], 4294967040 }
0x1091   :  { %1546 = vsyncpa [#allocation3], 1 }
0x1092   :  { %1547 = vsyncpa [#allocation6], 1 }
0x1093   :  { %1548 = vsyncpa [#allocation4], 1 }

</bundles_post_ra>
